<compile_context>
chip_gen: v7x
topology: tpu7x:2x2x1
jax: 0.10.0
libtpu: 0.0.40
codegen_flags: <defaults>
</compile_context>

<pallas_src>
import functools

import jax
import jax.numpy as jnp
import numpy as np
from jax import lax
from jax.experimental import pallas as pl
from jax.experimental.pallas import tpu as pltpu


# ---------------------------------------------------------------------------
# Hardware-aware sizing helpers
# ---------------------------------------------------------------------------
_VMEM_CACHE = {"queried": False, "bytes": None}


def _tpu_vmem_bytes():
    if not _VMEM_CACHE["queried"]:
        _VMEM_CACHE["queried"] = True
        try:
            _VMEM_CACHE["bytes"] = int(pltpu.get_tpu_info().vmem_capacity_bytes)
        except Exception:
            _VMEM_CACHE["bytes"] = None
    return _VMEM_CACHE["bytes"]


def _compiler_params(semantics):
    vmem = _tpu_vmem_bytes()
    if vmem is None:
        return pltpu.CompilerParams(dimension_semantics=semantics)
    # Leave headroom below physical VMEM (matters on v7x's 64 MiB parts).
    return pltpu.CompilerParams(
        dimension_semantics=semantics,
        vmem_limit_bytes=min(int(vmem * 3 // 4), 128 * 1024 * 1024))


def _pick_th(Ho, Wo, W, Cin, Cmid, Cout, stride):
    """Output-row tile: target ~512 matmul rows, bounded by a VMEM budget."""
    vmem = _tpu_vmem_bytes()
    budget = (vmem // 3) if vmem else 24 * 1024 * 1024
    th = max(1, min(Ho, pl.cdiv(512, Wo)))

    def footprint(th):
        ths = th * stride
        row_win = ths + (3 - stride)
        xwin = 2 * ths * W * Cin * 2 + 2 * (3 - stride) * W * Cin * 2  # dbl-buffered
        h1 = row_win * (W + 2) * Cmid * 2
        acc = th * Wo * Cmid * 4
        outb = 2 * th * Wo * Cout * 4
        wts = 2 * 2 * (Cin * Cmid + 9 * Cmid * Cmid + Cmid * Cout + Cin * Cout)
        return xwin + h1 + acc + outb + wts

    while th > 1 and footprint(th) > budget:
        th -= 1
    return th


# ---------------------------------------------------------------------------
# Fused bottleneck kernel (one output row-tile per grid step)
# ---------------------------------------------------------------------------
def _bottleneck_kernel(*refs, stride, TH, Wo, H, n_halo, fold, has_down):
    it = iter(refs)
    xA_ref = next(it)                               # (1, THs, W, Cin) bf16
    halo_refs = [next(it) for _ in range(n_halo)]   # n_halo x (1, 1, W, Cin)
    w1_ref, s1_ref, b1_ref = next(it), next(it), next(it)
    w2_ref, s2_ref, b2_ref = next(it), next(it), next(it)
    w3_ref, s3_ref, b3_ref = next(it), next(it), next(it)
    if has_down:
        wi_ref, si_ref, bi_ref = next(it), next(it), next(it)
    o_ref = next(it)                                # (1, TH, Wo, Cout)
    h1_ref, acc_ref = next(it), next(it)            # VMEM scratch

    THs = TH * stride
    row_win = THs + n_halo
    W = xA_ref.shape[2]
    Cin = xA_ref.shape[3]
    Cmid = acc_ref.shape[1]
    Cout = o_ref.shape[3]
    t = pl.program_id(1)

    # -- conv1 (1x1) + bn1 + relu into a W-padded bf16 VMEM scratch ----------
    # Window row i corresponds to H-padded row g = t*THs + i; original image
    # rows are padded indices 1..H.  Rows outside that range must be EXACT
    # zeros (conv2 zero-padding), not conv1(0) = relu(shift1), hence the mask.
    xv = xA_ref[0]                                   # (THs, W, Cin) bf16
    h = jnp.dot(xv.reshape(THs * W, Cin), w1_ref[...],
                preferred_element_type=jnp.float32)
    h = jnp.maximum(h * s1_ref[...] + b1_ref[...], 0.0).reshape(THs, W, Cmid)
    g = t * THs + lax.broadcasted_iota(jnp.int32, (THs, 1, 1), 0)
    h = jnp.where((g >= 1) & (g <= H), h, 0.0)
    h1_ref[0:THs, 1:W + 1, :] = h.astype(h1_ref.dtype)

    if n_halo == 1:
        halo_x = halo_refs[0][0]                     # (1, W, Cin)
    else:
        halo_x = jnp.concatenate([r[0] for r in halo_refs], axis=0)
    hh = jnp.dot(halo_x.reshape(n_halo * W, Cin), w1_ref[...],
                 preferred_element_type=jnp.float32)
    hh = jnp.maximum(hh * s1_ref[...] + b1_ref[...], 0.0).reshape(n_halo, W, Cmid)
    gh = t * THs + THs + lax.broadcasted_iota(jnp.int32, (n_halo, 1, 1), 0)
    hh = jnp.where((gh >= 1) & (gh <= H), hh, 0.0)
    h1_ref[THs:THs + n_halo, 1:W + 1, :] = hh.astype(h1_ref.dtype)

    # Left/right 1-px halo columns are exact zeros.
    zcol = jnp.zeros((row_win, 1, Cmid), h1_ref.dtype)
    h1_ref[:, 0:1, :] = zcol
    h1_ref[:, W + 1:W + 2, :] = zcol

    # -- conv2 (3x3, stride) accumulated in an f32 VMEM scratch --------------
    span_h = stride * (TH - 1) + 1
    span_w = stride * (Wo - 1) + 1
    first = True
    for kx in range(3):
        parts = []
        for ky in range(3):
            rows = h1_ref[ky:ky + span_h]            # (span_h, W+2, Cmid) bf16
            sub = lax.slice(rows, (0, kx, 0),
                            (span_h, kx + span_w, Cmid),
                            (stride, stride, 1))     # (TH, Wo, Cmid)
            parts.append(sub)
        if fold:
            # Fold the 3 ky taps into the contraction: K = 3*Cmid.
            operand = jnp.concatenate(parts, axis=-1).reshape(TH * Wo, 3 * Cmid)
            contrib = jnp.dot(operand, w2_ref[kx],
                              preferred_element_type=jnp.float32)
            if first:
                acc_ref[...] = contrib
                first = False
            else:
                acc_ref[...] += contrib
        else:
            for ky2 in range(3):
                operand = parts[ky2].reshape(TH * Wo, Cmid)
                contrib = jnp.dot(operand, w2_ref[ky2, kx],
                                  preferred_element_type=jnp.float32)
                if first:
                    acc_ref[...] = contrib
                    first = False
                else:
                    acc_ref[...] += contrib

    # -- bn2 + relu, conv3 (1x1) + bn3, identity/downsample add, relu --------
    h2 = jnp.maximum(acc_ref[...] * s2_ref[...] + b2_ref[...], 0.0)
    h2 = h2.astype(jnp.bfloat16)                     # (TH*Wo, Cmid)
    y = jnp.dot(h2, w3_ref[...], preferred_element_type=jnp.float32)
    y = y * s3_ref[...] + b3_ref[...]

    # Identity operand straight from the already-resident x window; the
    # stride-2 row/col subsample is done with strided VMEM slices (no HBM
    # pass).  Garbage rows beyond Ho only feed masked output rows.
    if stride == 1:
        if TH > 1:
            ids = jnp.concatenate([xv[1:TH], halo_x[0:1]], axis=0)  # (TH, W, Cin)
        else:
            ids = halo_x[0:1]
    else:
        id_rows = lax.slice(xv, (1, 0, 0),
                            (1 + stride * (TH - 1) + 1, W, Cin),
                            (stride, 1, 1))          # (TH, W, Cin)
        ids = lax.slice(id_rows, (0, 0, 0),
                        (TH, stride * (Wo - 1) + 1, Cin),
                        (1, stride, 1))              # (TH, Wo, Cin)
    ids2 = ids.reshape(TH * Wo, Cin)
    if has_down:
        idn = jnp.dot(ids2, wi_ref[...], preferred_element_type=jnp.float32)
        idn = idn * si_ref[...] + bi_ref[...]
    else:
        idn = ids2.astype(jnp.float32)

    out = jnp.maximum(y + idn, 0.0)
    o_ref[0] = out.reshape(TH, Wo, Cout).astype(o_ref.dtype)


# ---------------------------------------------------------------------------
# Wrappers
# ---------------------------------------------------------------------------
def bottleneck_forward_nhwc(x, params, *, stride, tile_rows=None):
    """Fused bottleneck on NHWC input; returns NHWC float32."""
    N, H, W, Cin = x.shape
    Cmid = params["w1"].shape[1]
    Cout = params["w3"].shape[1]
    has_down = "wi" in params
    if not has_down:
        assert stride == 1 and Cin == Cout
    Ho = (H - 1) // stride + 1
    Wo = (W - 1) // stride + 1

    TH = tile_rows if tile_rows is not None else _pick_th(
        Ho, Wo, W, Cin, Cmid, Cout, stride)
    TH = max(1, min(TH, Ho))
    Tn = pl.cdiv(Ho, TH)                 # masked partial last row tile
    THs = TH * stride
    n_halo = 3 - stride                  # extra rows needed below each tile

    # H-only zero pad (1 row on top, enough rows below so every window and the
    # trailing halo rows stay in bounds).  Fuses with the bf16 cast (and the
    # NCHW->NHWC transpose for PyTorch-layout callers) into one XLA pass.
    Hp = Tn * THs + n_halo
    assert Hp >= H + 1
    xp = jnp.pad(x.astype(jnp.bfloat16),
                 ((0, 0), (1, Hp - H - 1), (0, 0), (0, 0)))

    fold = Cmid <= 128
    w1 = params["w1"].astype(jnp.bfloat16)
    w2 = params["w2"].astype(jnp.bfloat16)           # (3, 3, Cmid, Cmid) HWIO
    if fold:
        # (kx, 3*Cmid, Cmid): row block ky*Cmid + ci.
        w2 = jnp.transpose(w2, (1, 0, 2, 3)).reshape(3, 3 * Cmid, Cmid)
    w3 = params["w3"].astype(jnp.bfloat16)

    def cvec(v):
        return v.reshape(1, -1).astype(jnp.float32)

    args = [xp]
    in_specs = [pl.BlockSpec((1, THs, W, Cin), lambda n, t: (n, t, 0, 0))]
    # 1-row halo windows of the same padded array (block size 1 => the index
    # map returns the row index directly, so no divisibility constraints).
    for j in range(n_halo):
        in_specs.append(pl.BlockSpec(
            (1, 1, W, Cin), lambda n, t, j=j: (n, t * THs + THs + j, 0, 0)))
        args.append(xp)

    def const_spec(shape):
        nd = len(shape)
        return pl.BlockSpec(shape, lambda n, t, nd=nd: (0,) * nd)

    weight_args = [w1, cvec(params["s1"]), cvec(params["b1"]),
                   w2, cvec(params["s2"]), cvec(params["b2"]),
                   w3, cvec(params["s3"]), cvec(params["b3"])]
    if has_down:
        weight_args += [params["wi"].astype(jnp.bfloat16),
                        cvec(params["si"]), cvec(params["bi"])]
    for a in weight_args:
        in_specs.append(const_spec(a.shape))
        args.append(a)

    kernel = functools.partial(
        _bottleneck_kernel, stride=stride, TH=TH, Wo=Wo, H=H,
        n_halo=n_halo, fold=fold, has_down=has_down)

    # NOTE: the partial last row tile reads garbage in its padded region of
    # the x window; those rows only feed output rows that Pallas masks on
    # store, and the conv1 row-validity mask zeroes them before conv2.
    return pl.pallas_call(
        kernel,
        grid=(N, Tn),
        in_specs=in_specs,
        out_specs=pl.BlockSpec((1, TH, Wo, Cout), lambda n, t: (n, t, 0, 0)),
        out_shape=jax.ShapeDtypeStruct((N, Ho, Wo, Cout), jnp.float32),
        scratch_shapes=[
            pltpu.VMEM((THs + n_halo, W + 2, Cmid), jnp.bfloat16),  # conv1 out
            pltpu.VMEM((TH * Wo, Cmid), jnp.float32),               # conv2 acc
        ],
        compiler_params=_compiler_params(("parallel", "parallel")),
    )(*args)


def bottleneck_forward(x_nchw, params, *, stride, tile_rows=None):
    """PyTorch-layout wrapper: NCHW in / NCHW out (like the nn.Module)."""
    x = jnp.transpose(x_nchw, (0, 2, 3, 1))          # NCHW -> NHWC
    out = bottleneck_forward_nhwc(x, params, stride=stride, tile_rows=tile_rows)
    return jnp.transpose(out, (0, 3, 1, 2))          # NHWC -> NCHW


# ---------------------------------------------------------------------------
# Deterministic parameter init (BN folded to scale/shift, eval mode)
# ---------------------------------------------------------------------------
def _fold_bn(gamma, beta, mean, var, eps=1e-5):
    scale = gamma / jnp.sqrt(var + eps)
    shift = beta - mean * scale
    return scale, shift


def init_params(key, in_plane, out_plane, stride):
    expansion = 4
    keys = jax.random.split(key, 8)

    def bn(k, c):
        k1, k2, k3, k4 = jax.random.split(k, 4)
        gamma = 1.0 + 0.1 * jax.random.normal(k1, (c,), jnp.float32)
        beta = 0.1 * jax.random.normal(k2, (c,), jnp.float32)
        mean = 0.1 * jax.random.normal(k3, (c,), jnp.float32)
        var = 1.0 + 0.1 * jnp.abs(jax.random.normal(k4, (c,), jnp.float32))
        return _fold_bn(gamma, beta, mean, var)

    p = {}
    p["w1"] = 0.1 * jax.random.normal(keys[0], (in_plane, out_plane), jnp.float32)
    p["s1"], p["b1"] = bn(keys[1], out_plane)
    p["w2"] = 0.1 * jax.random.normal(keys[2], (3, 3, out_plane, out_plane), jnp.float32)
    p["s2"], p["b2"] = bn(keys[3], out_plane)
    p["w3"] = 0.1 * jax.random.normal(keys[4], (out_plane, expansion * out_plane), jnp.float32)
    p["s3"], p["b3"] = bn(keys[5], expansion * out_plane)
    if stride != 1 or in_plane != expansion * out_plane:
        p["wi"] = 0.1 * jax.random.normal(keys[6], (in_plane, expansion * out_plane), jnp.float32)
        p["si"], p["bi"] = bn(keys[7], expansion * out_plane)
    return p


# ---------------------------------------------------------------------------
# Pure-JAX reference (mirrors the kernel's bf16 MXU operands / f32 accumulation)
# ---------------------------------------------------------------------------
def ref_bottleneck(x_nchw, params, *, stride):
    x = jnp.transpose(x_nchw, (0, 2, 3, 1))
    bf, f32 = jnp.bfloat16, jnp.float32
    xb = x.astype(bf)

    def mm(a, w):
        return jnp.einsum("nhwc,cd->nhwd", a.astype(bf), w.astype(bf),
                          preferred_element_type=f32)

    h1 = jax.nn.relu(mm(xb, params["w1"]) * params["s1"] + params["b1"]).astype(bf)
    h2 = lax.conv_general_dilated(h1, params["w2"].astype(bf), (stride, stride),
                                  ((1, 1), (1, 1)),
                                  dimension_numbers=("NHWC", "HWIO", "NHWC"),
                                  preferred_element_type=f32)
    h2 = jax.nn.relu(h2 * params["s2"] + params["b2"]).astype(bf)
    y3 = mm(h2, params["w3"]) * params["s3"] + params["b3"]
    if "wi" in params:
        xs = xb[:, ::stride, ::stride, :]
        idn = mm(xs, params["wi"]) * params["si"] + params["bi"]
    else:
        idn = xb.astype(f32)
    out = jax.nn.relu(y3 + idn)
    return jnp.transpose(out, (0, 3, 1, 2))


# ---------------------------------------------------------------------------
if __name__ == "__main__":
    def run_case(key, N, in_plane, out_plane, H, W, stride, tile_rows=None):
        kx, kp = jax.random.split(key)
        x = jax.random.normal(kx, (N, in_plane, H, W), jnp.float32)  # NCHW
        params = init_params(kp, in_plane, out_plane, stride)
        out = jax.block_until_ready(
            bottleneck_forward(x, params, stride=stride, tile_rows=tile_rows))
        ref = jax.block_until_ready(ref_bottleneck(x, params, stride=stride))
        Ho = (H - 1) // stride + 1
        Wo = (W - 1) // stride + 1
        assert out.shape == (N, 4 * out_plane, Ho, Wo), out.shape
        np.testing.assert_allclose(np.asarray(out, np.float32),
                                   np.asarray(ref, np.float32),
                                   atol=2e-2, rtol=2e-2)

    key = jax.random.PRNGKey(0)
    k1, k2, k3 = jax.random.split(key, 3)
    # Toy shape from the module defaults (downsample branch, stride 1); small
    # tile_rows so the multi-tile + partial-last-tile + halo paths run.
    run_case(k1, 2, 4, 4, 16, 16, 1, tile_rows=6)
    # Stride-2 downsample path with odd spatial size (pad/mask corner cases).
    run_case(k2, 2, 64, 64, 19, 19, 2, tile_rows=3)
    # Pure identity path (in_plane == 4 * out_plane, stride 1).
    run_case(k3, 2, 16, 4, 13, 13, 1)

    print("KERNEL_OK")
</pallas_src>

<mosaic_0001>
module attributes {stable_mosaic.version = 11 : i64} {
  func.func @_bottleneck_kernel(%arg0: i32, %arg1: i32, %arg2: memref<1x6x16x4xbf16, #tpu.memory_space<vmem>>, %arg3: memref<1x1x16x4xbf16, #tpu.memory_space<vmem>>, %arg4: memref<1x1x16x4xbf16, #tpu.memory_space<vmem>>, %arg5: memref<4x4xbf16, #tpu.memory_space<vmem>>, %arg6: memref<1x4xf32, #tpu.memory_space<vmem>>, %arg7: memref<1x4xf32, #tpu.memory_space<vmem>>, %arg8: memref<3x12x4xbf16, #tpu.memory_space<vmem>>, %arg9: memref<1x4xf32, #tpu.memory_space<vmem>>, %arg10: memref<1x4xf32, #tpu.memory_space<vmem>>, %arg11: memref<4x16xbf16, #tpu.memory_space<vmem>>, %arg12: memref<1x16xf32, #tpu.memory_space<vmem>>, %arg13: memref<1x16xf32, #tpu.memory_space<vmem>>, %arg14: memref<4x16xbf16, #tpu.memory_space<vmem>>, %arg15: memref<1x16xf32, #tpu.memory_space<vmem>>, %arg16: memref<1x16xf32, #tpu.memory_space<vmem>>, %arg17: memref<1x6x16x16xf32, #tpu.memory_space<vmem>>, %arg18: memref<8x18x4xbf16, #tpu.memory_space<vmem>>, %arg19: memref<96x4xf32, #tpu.memory_space<vmem>>) attributes {dimension_semantics = [#tpu.dimension_semantics<parallel>, #tpu.dimension_semantics<parallel>], iteration_bounds = array<i64: 2, 3>, scalar_prefetch = 0 : i64, scratch_operands = 2 : i64, tpu.core_type = #tpu.core_type<tc>, window_params = [{transform_indices = @transform_0, window_bounds = array<i64: 1, 6, 16, 4>}, {transform_indices = @transform_1, window_bounds = array<i64: 1, 1, 16, 4>}, {transform_indices = @transform_2, window_bounds = array<i64: 1, 1, 16, 4>}, {pipeline_mode = #tpu.pipeline_mode<synchronous>, transform_indices = @transform_3, window_bounds = array<i64: 4, 4>}, {pipeline_mode = #tpu.pipeline_mode<synchronous>, transform_indices = @transform_4, window_bounds = array<i64: 1, 4>}, {pipeline_mode = #tpu.pipeline_mode<synchronous>, transform_indices = @transform_5, window_bounds = array<i64: 1, 4>}, {pipeline_mode = #tpu.pipeline_mode<synchronous>, transform_indices = @transform_6, window_bounds = array<i64: 3, 12, 4>}, {pipeline_mode = #tpu.pipeline_mode<synchronous>, transform_indices = @transform_7, window_bounds = array<i64: 1, 4>}, {pipeline_mode = #tpu.pipeline_mode<synchronous>, transform_indices = @transform_8, window_bounds = array<i64: 1, 4>}, {pipeline_mode = #tpu.pipeline_mode<synchronous>, transform_indices = @transform_9, window_bounds = array<i64: 4, 16>}, {pipeline_mode = #tpu.pipeline_mode<synchronous>, transform_indices = @transform_10, window_bounds = array<i64: 1, 16>}, {pipeline_mode = #tpu.pipeline_mode<synchronous>, transform_indices = @transform_11, window_bounds = array<i64: 1, 16>}, {pipeline_mode = #tpu.pipeline_mode<synchronous>, transform_indices = @transform_12, window_bounds = array<i64: 4, 16>}, {pipeline_mode = #tpu.pipeline_mode<synchronous>, transform_indices = @transform_13, window_bounds = array<i64: 1, 16>}, {pipeline_mode = #tpu.pipeline_mode<synchronous>, transform_indices = @transform_14, window_bounds = array<i64: 1, 16>}, {transform_indices = @transform_15, window_bounds = array<i64: 1, 6, 16, 16>}]} {
    %c0 = arith.constant 0 : index
    %c0_0 = arith.constant 0 : index
    %c0_1 = arith.constant 0 : index
    %c0_2 = arith.constant 0 : index
    %0 = vector.load %arg2[%c0, %c0_0, %c0_1, %c0_2] : memref<1x6x16x4xbf16, #tpu.memory_space<vmem>>, vector<1x6x16x4xbf16>
    %1 = vector.shape_cast %0 : vector<1x6x16x4xbf16> to vector<6x16x4xbf16>
    %2 = vector.shape_cast %1 : vector<6x16x4xbf16> to vector<96x4xbf16>
    %c0_3 = arith.constant 0 : index
    %c0_4 = arith.constant 0 : index
    %3 = vector.load %arg5[%c0_3, %c0_4] : memref<4x4xbf16, #tpu.memory_space<vmem>>, vector<4x4xbf16>
    %cst = arith.constant dense<0.000000e+00> : vector<96x4xf32>
    %4 = tpu.matmul %2, %3, %cst {dimension_numbers = #tpu.dot_dimension_numbers<[1], [0], [0], [1], [0, 0, 1, 1], [], []>} : vector<96x4xbf16>, vector<4x4xbf16>, vector<96x4xf32> -> vector<96x4xf32>
    %c0_5 = arith.constant 0 : index
    %c0_6 = arith.constant 0 : index
    %5 = vector.load %arg6[%c0_5, %c0_6] : memref<1x4xf32, #tpu.memory_space<vmem>>, vector<1x4xf32>
    %6 = vector.broadcast %5 : vector<1x4xf32> to vector<96x4xf32>
    %7 = arith.mulf %4, %6 : vector<96x4xf32>
    %c0_7 = arith.constant 0 : index
    %c0_8 = arith.constant 0 : index
    %8 = vector.load %arg7[%c0_7, %c0_8] : memref<1x4xf32, #tpu.memory_space<vmem>>, vector<1x4xf32>
    %9 = vector.broadcast %8 : vector<1x4xf32> to vector<96x4xf32>
    %10 = arith.addf %7, %9 : vector<96x4xf32>
    %cst_9 = arith.constant 0.000000e+00 : f32
    %11 = vector.broadcast %cst_9 : f32 to vector<96x4xf32>
    %12 = arith.maximumf %10, %11 : vector<96x4xf32>
    %13 = vector.shape_cast %12 : vector<96x4xf32> to vector<6x16x4xf32>
    %c6_i32 = arith.constant 6 : i32
    %14 = arith.muli %arg1, %c6_i32 : i32
    %15 = tpu.iota {dimensions = array<i32: 0>} : vector<6x1x1xi32>
    %16 = vector.broadcast %14 : i32 to vector<6x1x1xi32>
    %17 = arith.addi %16, %15 : vector<6x1x1xi32>
    %c1_i32 = arith.constant 1 : i32
    %18 = vector.broadcast %c1_i32 : i32 to vector<6x1x1xi32>
    %19 = arith.cmpi sge, %17, %18 : vector<6x1x1xi32>
    %c16_i32 = arith.constant 16 : i32
    %20 = vector.broadcast %c16_i32 : i32 to vector<6x1x1xi32>
    %21 = arith.cmpi sle, %17, %20 : vector<6x1x1xi32>
    %22 = arith.andi %19, %21 : vector<6x1x1xi1>
    %cst_10 = arith.constant 0.000000e+00 : f32
    %23 = vector.shape_cast %22 : vector<6x1x1xi1> to vector<6x1x1xi1>
    %24 = vector.broadcast %23 : vector<6x1x1xi1> to vector<6x16x4xi1>
    %25 = vector.broadcast %cst_10 : f32 to vector<6x16x4xf32>
    %26 = arith.select %24, %13, %25 : vector<6x16x4xi1>, vector<6x16x4xf32>
    %27 = arith.truncf %26 : vector<6x16x4xf32> to vector<6x16x4xbf16>
    %c0_11 = arith.constant 0 : index
    %c1 = arith.constant 1 : index
    %c0_12 = arith.constant 0 : index
    %28 = vector.load %arg18[%c0_11, %c1, %c0_12] : memref<8x18x4xbf16, #tpu.memory_space<vmem>>, vector<6x16x4xbf16>
    tpu.vector_store %arg18[%c0_11, %c1, %c0_12], %27 {strides = array<i32>} : memref<8x18x4xbf16, #tpu.memory_space<vmem>>, vector<6x16x4xbf16>,
    %c0_13 = arith.constant 0 : index
    %c0_14 = arith.constant 0 : index
    %c0_15 = arith.constant 0 : index
    %c0_16 = arith.constant 0 : index
    %29 = vector.load %arg3[%c0_13, %c0_14, %c0_15, %c0_16] : memref<1x1x16x4xbf16, #tpu.memory_space<vmem>>, vector<1x1x16x4xbf16>
    %30 = vector.shape_cast %29 : vector<1x1x16x4xbf16> to vector<1x16x4xbf16>
    %c0_17 = arith.constant 0 : index
    %c0_18 = arith.constant 0 : index
    %c0_19 = arith.constant 0 : index
    %c0_20 = arith.constant 0 : index
    %31 = vector.load %arg4[%c0_17, %c0_18, %c0_19, %c0_20] : memref<1x1x16x4xbf16, #tpu.memory_space<vmem>>, vector<1x1x16x4xbf16>
    %32 = vector.shape_cast %31 : vector<1x1x16x4xbf16> to vector<1x16x4xbf16>
    %33 = tpu.concatenate %30, %32 in 0 : vector<1x16x4xbf16>, vector<1x16x4xbf16> -> vector<2x16x4xbf16>
    %34 = vector.shape_cast %33 : vector<2x16x4xbf16> to vector<32x4xbf16>
    %c0_21 = arith.constant 0 : index
    %c0_22 = arith.constant 0 : index
    %35 = vector.load %arg5[%c0_21, %c0_22] : memref<4x4xbf16, #tpu.memory_space<vmem>>, vector<4x4xbf16>
    %cst_23 = arith.constant dense<0.000000e+00> : vector<32x4xf32>
    %36 = tpu.matmul %34, %35, %cst_23 {dimension_numbers = #tpu.dot_dimension_numbers<[1], [0], [0], [1], [0, 0, 1, 1], [], []>} : vector<32x4xbf16>, vector<4x4xbf16>, vector<32x4xf32> -> vector<32x4xf32>
    %c0_24 = arith.constant 0 : index
    %c0_25 = arith.constant 0 : index
    %37 = vector.load %arg6[%c0_24, %c0_25] : memref<1x4xf32, #tpu.memory_space<vmem>>, vector<1x4xf32>
    %38 = vector.broadcast %37 : vector<1x4xf32> to vector<32x4xf32>
    %39 = arith.mulf %36, %38 : vector<32x4xf32>
    %c0_26 = arith.constant 0 : index
    %c0_27 = arith.constant 0 : index
    %40 = vector.load %arg7[%c0_26, %c0_27] : memref<1x4xf32, #tpu.memory_space<vmem>>, vector<1x4xf32>
    %41 = vector.broadcast %40 : vector<1x4xf32> to vector<32x4xf32>
    %42 = arith.addf %39, %41 : vector<32x4xf32>
    %cst_28 = arith.constant 0.000000e+00 : f32
    %43 = vector.broadcast %cst_28 : f32 to vector<32x4xf32>
    %44 = arith.maximumf %42, %43 : vector<32x4xf32>
    %45 = vector.shape_cast %44 : vector<32x4xf32> to vector<2x16x4xf32>
    %c6_i32_29 = arith.constant 6 : i32
    %46 = arith.muli %arg1, %c6_i32_29 : i32
    %c6_i32_30 = arith.constant 6 : i32
    %47 = arith.addi %46, %c6_i32_30 : i32
    %48 = tpu.iota {dimensions = array<i32: 0>} : vector<2x1x1xi32>
    %49 = vector.broadcast %47 : i32 to vector<2x1x1xi32>
    %50 = arith.addi %49, %48 : vector<2x1x1xi32>
    %c1_i32_31 = arith.constant 1 : i32
    %51 = vector.broadcast %c1_i32_31 : i32 to vector<2x1x1xi32>
    %52 = arith.cmpi sge, %50, %51 : vector<2x1x1xi32>
    %c16_i32_32 = arith.constant 16 : i32
    %53 = vector.broadcast %c16_i32_32 : i32 to vector<2x1x1xi32>
    %54 = arith.cmpi sle, %50, %53 : vector<2x1x1xi32>
    %55 = arith.andi %52, %54 : vector<2x1x1xi1>
    %cst_33 = arith.constant 0.000000e+00 : f32
    %56 = vector.shape_cast %55 : vector<2x1x1xi1> to vector<2x1x1xi1>
    %57 = vector.broadcast %56 : vector<2x1x1xi1> to vector<2x16x4xi1>
    %58 = vector.broadcast %cst_33 : f32 to vector<2x16x4xf32>
    %59 = arith.select %57, %45, %58 : vector<2x16x4xi1>, vector<2x16x4xf32>
    %60 = arith.truncf %59 : vector<2x16x4xf32> to vector<2x16x4xbf16>
    %c6 = arith.constant 6 : index
    %c1_34 = arith.constant 1 : index
    %c0_35 = arith.constant 0 : index
    %61 = vector.load %arg18[%c6, %c1_34, %c0_35] : memref<8x18x4xbf16, #tpu.memory_space<vmem>>, vector<2x16x4xbf16>
    tpu.vector_store %arg18[%c6, %c1_34, %c0_35], %60 {strides = array<i32>} : memref<8x18x4xbf16, #tpu.memory_space<vmem>>, vector<2x16x4xbf16>,
    %cst_36 = arith.constant 0.000000e+00 : bf16
    %62 = vector.broadcast %cst_36 : bf16 to vector<8x1x4xbf16>
    %c0_37 = arith.constant 0 : index
    %c0_38 = arith.constant 0 : index
    %c0_39 = arith.constant 0 : index
    %63 = vector.load %arg18[%c0_37, %c0_38, %c0_39] : memref<8x18x4xbf16, #tpu.memory_space<vmem>>, vector<8x1x4xbf16>
    tpu.vector_store %arg18[%c0_37, %c0_38, %c0_39], %62 {strides = array<i32>} : memref<8x18x4xbf16, #tpu.memory_space<vmem>>, vector<8x1x4xbf16>,
    %c0_40 = arith.constant 0 : index
    %c17 = arith.constant 17 : index
    %c0_41 = arith.constant 0 : index
    %64 = vector.load %arg18[%c0_40, %c17, %c0_41] : memref<8x18x4xbf16, #tpu.memory_space<vmem>>, vector<8x1x4xbf16>
    tpu.vector_store %arg18[%c0_40, %c17, %c0_41], %62 {strides = array<i32>} : memref<8x18x4xbf16, #tpu.memory_space<vmem>>, vector<8x1x4xbf16>,
    %c0_42 = arith.constant 0 : index
    %c0_43 = arith.constant 0 : index
    %c0_44 = arith.constant 0 : index
    %65 = vector.load %arg18[%c0_42, %c0_43, %c0_44] : memref<8x18x4xbf16, #tpu.memory_space<vmem>>, vector<6x18x4xbf16>
    %66 = vector.extract_strided_slice %65 {offsets = [0, 0, 0], sizes = [6, 16, 4], strides = [1, 1, 1]} : vector<6x18x4xbf16> to vector<6x16x4xbf16>
    %c1_45 = arith.constant 1 : index
    %c0_46 = arith.constant 0 : index
    %c0_47 = arith.constant 0 : index
    %67 = vector.load %arg18[%c1_45, %c0_46, %c0_47] : memref<8x18x4xbf16, #tpu.memory_space<vmem>>, vector<6x18x4xbf16>
    %68 = vector.extract_strided_slice %67 {offsets = [0, 0, 0], sizes = [6, 16, 4], strides = [1, 1, 1]} : vector<6x18x4xbf16> to vector<6x16x4xbf16>
    %c2 = arith.constant 2 : index
    %c0_48 = arith.constant 0 : index
    %c0_49 = arith.constant 0 : index
    %69 = vector.load %arg18[%c2, %c0_48, %c0_49] : memref<8x18x4xbf16, #tpu.memory_space<vmem>>, vector<6x18x4xbf16>
    %70 = vector.extract_strided_slice %69 {offsets = [0, 0, 0], sizes = [6, 16, 4], strides = [1, 1, 1]} : vector<6x18x4xbf16> to vector<6x16x4xbf16>
    %71 = tpu.concatenate %66, %68, %70 in 2 : vector<6x16x4xbf16>, vector<6x16x4xbf16>, vector<6x16x4xbf16> -> vector<6x16x12xbf16>
    %72 = vector.shape_cast %71 : vector<6x16x12xbf16> to vector<96x12xbf16>
    %c0_50 = arith.constant 0 : index
    %c0_51 = arith.constant 0 : index
    %c0_52 = arith.constant 0 : index
    %73 = vector.load %arg8[%c0_50, %c0_51, %c0_52] : memref<3x12x4xbf16, #tpu.memory_space<vmem>>, vector<1x12x4xbf16>
    %74 = vector.shape_cast %73 : vector<1x12x4xbf16> to vector<12x4xbf16>
    %cst_53 = arith.constant dense<0.000000e+00> : vector<96x4xf32>
    %75 = tpu.matmul %72, %74, %cst_53 {dimension_numbers = #tpu.dot_dimension_numbers<[1], [0], [0], [1], [0, 0, 1, 1], [], []>} : vector<96x12xbf16>, vector<12x4xbf16>, vector<96x4xf32> -> vector<96x4xf32>
    %c0_54 = arith.constant 0 : index
    %c0_55 = arith.constant 0 : index
    %76 = vector.load %arg19[%c0_54, %c0_55] : memref<96x4xf32, #tpu.memory_space<vmem>>, vector<96x4xf32>
    tpu.vector_store %arg19[%c0_54, %c0_55], %75 {strides = array<i32>} : memref<96x4xf32, #tpu.memory_space<vmem>>, vector<96x4xf32>,
    %c0_56 = arith.constant 0 : index
    %c0_57 = arith.constant 0 : index
    %c0_58 = arith.constant 0 : index
    %77 = vector.load %arg18[%c0_56, %c0_57, %c0_58] : memref<8x18x4xbf16, #tpu.memory_space<vmem>>, vector<6x18x4xbf16>
    %78 = vector.extract_strided_slice %77 {offsets = [0, 1, 0], sizes = [6, 16, 4], strides = [1, 1, 1]} : vector<6x18x4xbf16> to vector<6x16x4xbf16>
    %c1_59 = arith.constant 1 : index
    %c0_60 = arith.constant 0 : index
    %c0_61 = arith.constant 0 : index
    %79 = vector.load %arg18[%c1_59, %c0_60, %c0_61] : memref<8x18x4xbf16, #tpu.memory_space<vmem>>, vector<6x18x4xbf16>
    %80 = vector.extract_strided_slice %79 {offsets = [0, 1, 0], sizes = [6, 16, 4], strides = [1, 1, 1]} : vector<6x18x4xbf16> to vector<6x16x4xbf16>
    %c2_62 = arith.constant 2 : index
    %c0_63 = arith.constant 0 : index
    %c0_64 = arith.constant 0 : index
    %81 = vector.load %arg18[%c2_62, %c0_63, %c0_64] : memref<8x18x4xbf16, #tpu.memory_space<vmem>>, vector<6x18x4xbf16>
    %82 = vector.extract_strided_slice %81 {offsets = [0, 1, 0], sizes = [6, 16, 4], strides = [1, 1, 1]} : vector<6x18x4xbf16> to vector<6x16x4xbf16>
    %83 = tpu.concatenate %78, %80, %82 in 2 : vector<6x16x4xbf16>, vector<6x16x4xbf16>, vector<6x16x4xbf16> -> vector<6x16x12xbf16>
    %84 = vector.shape_cast %83 : vector<6x16x12xbf16> to vector<96x12xbf16>
    %c1_65 = arith.constant 1 : index
    %c0_66 = arith.constant 0 : index
    %c0_67 = arith.constant 0 : index
    %85 = vector.load %arg8[%c1_65, %c0_66, %c0_67] : memref<3x12x4xbf16, #tpu.memory_space<vmem>>, vector<1x12x4xbf16>
    %86 = vector.shape_cast %85 : vector<1x12x4xbf16> to vector<12x4xbf16>
    %cst_68 = arith.constant dense<0.000000e+00> : vector<96x4xf32>
    %87 = tpu.matmul %84, %86, %cst_68 {dimension_numbers = #tpu.dot_dimension_numbers<[1], [0], [0], [1], [0, 0, 1, 1], [], []>} : vector<96x12xbf16>, vector<12x4xbf16>, vector<96x4xf32> -> vector<96x4xf32>
    %c0_69 = arith.constant 0 : index
    %c0_70 = arith.constant 0 : index
    %88 = vector.load %arg19[%c0_69, %c0_70] : memref<96x4xf32, #tpu.memory_space<vmem>>, vector<96x4xf32>
    %89 = arith.addf %88, %87 : vector<96x4xf32>
    %c0_71 = arith.constant 0 : index
    %c0_72 = arith.constant 0 : index
    %90 = vector.load %arg19[%c0_71, %c0_72] : memref<96x4xf32, #tpu.memory_space<vmem>>, vector<96x4xf32>
    tpu.vector_store %arg19[%c0_71, %c0_72], %89 {strides = array<i32>} : memref<96x4xf32, #tpu.memory_space<vmem>>, vector<96x4xf32>,
    %c0_73 = arith.constant 0 : index
    %c0_74 = arith.constant 0 : index
    %c0_75 = arith.constant 0 : index
    %91 = vector.load %arg18[%c0_73, %c0_74, %c0_75] : memref<8x18x4xbf16, #tpu.memory_space<vmem>>, vector<6x18x4xbf16>
    %92 = vector.extract_strided_slice %91 {offsets = [0, 2, 0], sizes = [6, 16, 4], strides = [1, 1, 1]} : vector<6x18x4xbf16> to vector<6x16x4xbf16>
    %c1_76 = arith.constant 1 : index
    %c0_77 = arith.constant 0 : index
    %c0_78 = arith.constant 0 : index
    %93 = vector.load %arg18[%c1_76, %c0_77, %c0_78] : memref<8x18x4xbf16, #tpu.memory_space<vmem>>, vector<6x18x4xbf16>
    %94 = vector.extract_strided_slice %93 {offsets = [0, 2, 0], sizes = [6, 16, 4], strides = [1, 1, 1]} : vector<6x18x4xbf16> to vector<6x16x4xbf16>
    %c2_79 = arith.constant 2 : index
    %c0_80 = arith.constant 0 : index
    %c0_81 = arith.constant 0 : index
    %95 = vector.load %arg18[%c2_79, %c0_80, %c0_81] : memref<8x18x4xbf16, #tpu.memory_space<vmem>>, vector<6x18x4xbf16>
    %96 = vector.extract_strided_slice %95 {offsets = [0, 2, 0], sizes = [6, 16, 4], strides = [1, 1, 1]} : vector<6x18x4xbf16> to vector<6x16x4xbf16>
    %97 = tpu.concatenate %92, %94, %96 in 2 : vector<6x16x4xbf16>, vector<6x16x4xbf16>, vector<6x16x4xbf16> -> vector<6x16x12xbf16>
    %98 = vector.shape_cast %97 : vector<6x16x12xbf16> to vector<96x12xbf16>
    %c2_82 = arith.constant 2 : index
    %c0_83 = arith.constant 0 : index
    %c0_84 = arith.constant 0 : index
    %99 = vector.load %arg8[%c2_82, %c0_83, %c0_84] : memref<3x12x4xbf16, #tpu.memory_space<vmem>>, vector<1x12x4xbf16>
    %100 = vector.shape_cast %99 : vector<1x12x4xbf16> to vector<12x4xbf16>
    %cst_85 = arith.constant dense<0.000000e+00> : vector<96x4xf32>
    %101 = tpu.matmul %98, %100, %cst_85 {dimension_numbers = #tpu.dot_dimension_numbers<[1], [0], [0], [1], [0, 0, 1, 1], [], []>} : vector<96x12xbf16>, vector<12x4xbf16>, vector<96x4xf32> -> vector<96x4xf32>
    %c0_86 = arith.constant 0 : index
    %c0_87 = arith.constant 0 : index
    %102 = vector.load %arg19[%c0_86, %c0_87] : memref<96x4xf32, #tpu.memory_space<vmem>>, vector<96x4xf32>
    %103 = arith.addf %102, %101 : vector<96x4xf32>
    %c0_88 = arith.constant 0 : index
    %c0_89 = arith.constant 0 : index
    %104 = vector.load %arg19[%c0_88, %c0_89] : memref<96x4xf32, #tpu.memory_space<vmem>>, vector<96x4xf32>
    tpu.vector_store %arg19[%c0_88, %c0_89], %103 {strides = array<i32>} : memref<96x4xf32, #tpu.memory_space<vmem>>, vector<96x4xf32>,
    %c0_90 = arith.constant 0 : index
    %c0_91 = arith.constant 0 : index
    %105 = vector.load %arg19[%c0_90, %c0_91] : memref<96x4xf32, #tpu.memory_space<vmem>>, vector<96x4xf32>
    %c0_92 = arith.constant 0 : index
    %c0_93 = arith.constant 0 : index
    %106 = vector.load %arg9[%c0_92, %c0_93] : memref<1x4xf32, #tpu.memory_space<vmem>>, vector<1x4xf32>
    %107 = vector.broadcast %106 : vector<1x4xf32> to vector<96x4xf32>
    %108 = arith.mulf %105, %107 : vector<96x4xf32>
    %c0_94 = arith.constant 0 : index
    %c0_95 = arith.constant 0 : index
    %109 = vector.load %arg10[%c0_94, %c0_95] : memref<1x4xf32, #tpu.memory_space<vmem>>, vector<1x4xf32>
    %110 = vector.broadcast %109 : vector<1x4xf32> to vector<96x4xf32>
    %111 = arith.addf %108, %110 : vector<96x4xf32>
    %cst_96 = arith.constant 0.000000e+00 : f32
    %112 = vector.broadcast %cst_96 : f32 to vector<96x4xf32>
    %113 = arith.maximumf %111, %112 : vector<96x4xf32>
    %114 = arith.truncf %113 : vector<96x4xf32> to vector<96x4xbf16>
    %c0_97 = arith.constant 0 : index
    %c0_98 = arith.constant 0 : index
    %115 = vector.load %arg11[%c0_97, %c0_98] : memref<4x16xbf16, #tpu.memory_space<vmem>>, vector<4x16xbf16>
    %cst_99 = arith.constant dense<0.000000e+00> : vector<96x16xf32>
    %116 = tpu.matmul %114, %115, %cst_99 {dimension_numbers = #tpu.dot_dimension_numbers<[1], [0], [0], [1], [0, 0, 1, 1], [], []>} : vector<96x4xbf16>, vector<4x16xbf16>, vector<96x16xf32> -> vector<96x16xf32>
    %c0_100 = arith.constant 0 : index
    %c0_101 = arith.constant 0 : index
    %117 = vector.load %arg12[%c0_100, %c0_101] : memref<1x16xf32, #tpu.memory_space<vmem>>, vector<1x16xf32>
    %118 = vector.broadcast %117 : vector<1x16xf32> to vector<96x16xf32>
    %119 = arith.mulf %116, %118 : vector<96x16xf32>
    %c0_102 = arith.constant 0 : index
    %c0_103 = arith.constant 0 : index
    %120 = vector.load %arg13[%c0_102, %c0_103] : memref<1x16xf32, #tpu.memory_space<vmem>>, vector<1x16xf32>
    %121 = vector.broadcast %120 : vector<1x16xf32> to vector<96x16xf32>
    %122 = arith.addf %119, %121 : vector<96x16xf32>
    %123 = vector.extract_strided_slice %1 {offsets = [1, 0, 0], sizes = [5, 16, 4], strides = [1, 1, 1]} : vector<6x16x4xbf16> to vector<5x16x4xbf16>
    %124 = vector.extract_strided_slice %33 {offsets = [0, 0, 0], sizes = [1, 16, 4], strides = [1, 1, 1]} : vector<2x16x4xbf16> to vector<1x16x4xbf16>
    %125 = tpu.concatenate %123, %124 in 0 : vector<5x16x4xbf16>, vector<1x16x4xbf16> -> vector<6x16x4xbf16>
    %126 = vector.shape_cast %125 : vector<6x16x4xbf16> to vector<96x4xbf16>
    %c0_104 = arith.constant 0 : index
    %c0_105 = arith.constant 0 : index
    %127 = vector.load %arg14[%c0_104, %c0_105] : memref<4x16xbf16, #tpu.memory_space<vmem>>, vector<4x16xbf16>
    %cst_106 = arith.constant dense<0.000000e+00> : vector<96x16xf32>
    %128 = tpu.matmul %126, %127, %cst_106 {dimension_numbers = #tpu.dot_dimension_numbers<[1], [0], [0], [1], [0, 0, 1, 1], [], []>} : vector<96x4xbf16>, vector<4x16xbf16>, vector<96x16xf32> -> vector<96x16xf32>
    %c0_107 = arith.constant 0 : index
    %c0_108 = arith.constant 0 : index
    %129 = vector.load %arg15[%c0_107, %c0_108] : memref<1x16xf32, #tpu.memory_space<vmem>>, vector<1x16xf32>
    %130 = vector.broadcast %129 : vector<1x16xf32> to vector<96x16xf32>
    %131 = arith.mulf %128, %130 : vector<96x16xf32>
    %c0_109 = arith.constant 0 : index
    %c0_110 = arith.constant 0 : index
    %132 = vector.load %arg16[%c0_109, %c0_110] : memref<1x16xf32, #tpu.memory_space<vmem>>, vector<1x16xf32>
    %133 = vector.broadcast %132 : vector<1x16xf32> to vector<96x16xf32>
    %134 = arith.addf %131, %133 : vector<96x16xf32>
    %135 = arith.addf %122, %134 : vector<96x16xf32>
    %cst_111 = arith.constant 0.000000e+00 : f32
    %136 = vector.broadcast %cst_111 : f32 to vector<96x16xf32>
    %137 = arith.maximumf %135, %136 : vector<96x16xf32>
    %138 = vector.shape_cast %137 : vector<96x16xf32> to vector<6x16x16xf32>
    %c0_112 = arith.constant 0 : index
    %c0_113 = arith.constant 0 : index
    %c0_114 = arith.constant 0 : index
    %c0_115 = arith.constant 0 : index
    %139 = vector.load %arg17[%c0_112, %c0_113, %c0_114, %c0_115] : memref<1x6x16x16xf32, #tpu.memory_space<vmem>>, vector<1x6x16x16xf32>
    %140 = vector.shape_cast %139 : vector<1x6x16x16xf32> to vector<6x16x16xf32>
    %141 = vector.shape_cast %138 : vector<6x16x16xf32> to vector<1x6x16x16xf32>
    tpu.vector_store %arg17[%c0_112, %c0_113, %c0_114, %c0_115], %141 {strides = array<i32>} : memref<1x6x16x16xf32, #tpu.memory_space<vmem>>, vector<1x6x16x16xf32>,
    return
  }
  func.func @transform_0(%arg0: i32, %arg1: i32) -> (i32, i32, i32, i32) {
    %c0_i32 = arith.constant 0 : i32
    %c0_i32_0 = arith.constant 0 : i32
    %c0_i32_1 = arith.constant 0 : i32
    return %arg0, %arg1, %c0_i32, %c0_i32_0 : i32, i32, i32, i32
  }
  func.func @transform_1(%arg0: i32, %arg1: i32) -> (i32, i32, i32, i32) {
    %c6_i32 = arith.constant 6 : i32
    %0 = arith.muli %arg1, %c6_i32 : i32
    %c6_i32_0 = arith.constant 6 : i32
    %1 = arith.addi %0, %c6_i32_0 : i32
    %c0_i32 = arith.constant 0 : i32
    %2 = arith.addi %1, %c0_i32 : i32
    %c0_i32_1 = arith.constant 0 : i32
    %c0_i32_2 = arith.constant 0 : i32
    %c0_i32_3 = arith.constant 0 : i32
    return %arg0, %2, %c0_i32_1, %c0_i32_2 : i32, i32, i32, i32
  }
  func.func @transform_2(%arg0: i32, %arg1: i32) -> (i32, i32, i32, i32) {
    %c6_i32 = arith.constant 6 : i32
    %0 = arith.muli %arg1, %c6_i32 : i32
    %c6_i32_0 = arith.constant 6 : i32
    %1 = arith.addi %0, %c6_i32_0 : i32
    %c1_i32 = arith.constant 1 : i32
    %2 = arith.addi %1, %c1_i32 : i32
    %c0_i32 = arith.constant 0 : i32
    %c0_i32_1 = arith.constant 0 : i32
    %c0_i32_2 = arith.constant 0 : i32
    return %arg0, %2, %c0_i32, %c0_i32_1 : i32, i32, i32, i32
  }
  func.func @transform_3(%arg0: i32, %arg1: i32) -> (i32, i32) {
    %c0_i32 = arith.constant 0 : i32
    %c0_i32_0 = arith.constant 0 : i32
    %c0_i32_1 = arith.constant 0 : i32
    return %c0_i32, %c0_i32_0 : i32, i32
  }
  func.func @transform_4(%arg0: i32, %arg1: i32) -> (i32, i32) {
    %c0_i32 = arith.constant 0 : i32
    %c0_i32_0 = arith.constant 0 : i32
    %c0_i32_1 = arith.constant 0 : i32
    return %c0_i32, %c0_i32_0 : i32, i32
  }
  func.func @transform_5(%arg0: i32, %arg1: i32) -> (i32, i32) {
    %c0_i32 = arith.constant 0 : i32
    %c0_i32_0 = arith.constant 0 : i32
    %c0_i32_1 = arith.constant 0 : i32
    return %c0_i32, %c0_i32_0 : i32, i32
  }
  func.func @transform_6(%arg0: i32, %arg1: i32) -> (i32, i32, i32) {
    %c0_i32 = arith.constant 0 : i32
    %c0_i32_0 = arith.constant 0 : i32
    %c0_i32_1 = arith.constant 0 : i32
    %c0_i32_2 = arith.constant 0 : i32
    return %c0_i32, %c0_i32_0, %c0_i32_1 : i32, i32, i32
  }
  func.func @transform_7(%arg0: i32, %arg1: i32) -> (i32, i32) {
    %c0_i32 = arith.constant 0 : i32
    %c0_i32_0 = arith.constant 0 : i32
    %c0_i32_1 = arith.constant 0 : i32
    return %c0_i32, %c0_i32_0 : i32, i32
  }
  func.func @transform_8(%arg0: i32, %arg1: i32) -> (i32, i32) {
    %c0_i32 = arith.constant 0 : i32
    %c0_i32_0 = arith.constant 0 : i32
    %c0_i32_1 = arith.constant 0 : i32
    return %c0_i32, %c0_i32_0 : i32, i32
  }
  func.func @transform_9(%arg0: i32, %arg1: i32) -> (i32, i32) {
    %c0_i32 = arith.constant 0 : i32
    %c0_i32_0 = arith.constant 0 : i32
    %c0_i32_1 = arith.constant 0 : i32
    return %c0_i32, %c0_i32_0 : i32, i32
  }
  func.func @transform_10(%arg0: i32, %arg1: i32) -> (i32, i32) {
    %c0_i32 = arith.constant 0 : i32
    %c0_i32_0 = arith.constant 0 : i32
    %c0_i32_1 = arith.constant 0 : i32
    return %c0_i32, %c0_i32_0 : i32, i32
  }
  func.func @transform_11(%arg0: i32, %arg1: i32) -> (i32, i32) {
    %c0_i32 = arith.constant 0 : i32
    %c0_i32_0 = arith.constant 0 : i32
    %c0_i32_1 = arith.constant 0 : i32
    return %c0_i32, %c0_i32_0 : i32, i32
  }
  func.func @transform_12(%arg0: i32, %arg1: i32) -> (i32, i32) {
    %c0_i32 = arith.constant 0 : i32
    %c0_i32_0 = arith.constant 0 : i32
    %c0_i32_1 = arith.constant 0 : i32
    return %c0_i32, %c0_i32_0 : i32, i32
  }
  func.func @transform_13(%arg0: i32, %arg1: i32) -> (i32, i32) {
    %c0_i32 = arith.constant 0 : i32
    %c0_i32_0 = arith.constant 0 : i32
    %c0_i32_1 = arith.constant 0 : i32
    return %c0_i32, %c0_i32_0 : i32, i32
  }
  func.func @transform_14(%arg0: i32, %arg1: i32) -> (i32, i32) {
    %c0_i32 = arith.constant 0 : i32
    %c0_i32_0 = arith.constant 0 : i32
    %c0_i32_1 = arith.constant 0 : i32
    return %c0_i32, %c0_i32_0 : i32, i32
  }
  func.func @transform_15(%arg0: i32, %arg1: i32) -> (i32, i32, i32, i32) {
    %c0_i32 = arith.constant 0 : i32
    %c0_i32_0 = arith.constant 0 : i32
    %c0_i32_1 = arith.constant 0 : i32
    return %arg0, %arg1, %c0_i32, %c0_i32_0 : i32, i32, i32, i32
  }
}

</mosaic_0001>

<bundles_post_ra>
// kernel: tpu_custom_call.1
= control target key start
LH: loop header
LB: loop body
LE: loop exit
PB: predicated region body
PF: predicated region fallthrough
CT: control target
= control target key end

     0   :  { %s4804_s0 = inlined_call_operand.vmem [shape: bf16[2,20,16,4], index: 0, kind: input, shape index: {}]   ;;  %s4805_s1 = inlined_call_operand.vmem [shape: bf16[2,20,16,4], index: 1, kind: input, shape index: {}]   ;;  %s4806_s2 = inlined_call_operand.vmem [shape: bf16[2,20,16,4], index: 2, kind: input, shape index: {}]   ;;  %s4807_s3 = inlined_call_operand.vmem [shape: bf16[4,4], index: 3, kind: input, shape index: {}]   ;;  %s4808_s4 = inlined_call_operand.vmem [shape: f32[1,4], index: 4, kind: input, shape index: {}]   ;;  %s4809_s5 = inlined_call_operand.vmem [shape: f32[1,4], index: 5, kind: input, shape index: {}]   ;;  %s4810_s6 = inlined_call_operand.vmem [shape: bf16[3,12,4], index: 6, kind: input, shape index: {}]   ;;  %s4811_s7 = inlined_call_operand.vmem [shape: f32[1,4], index: 7, kind: input, shape index: {}]   ;;  %s4812_s8 = inlined_call_operand.vmem [shape: f32[1,4], index: 8, kind: input, shape index: {}]   ;;  %s4813_s9 = inlined_call_operand.vmem [shape: bf16[4,16], index: 9, kind: input, shape index: {}]   ;;  %s4814_s10 = inlined_call_operand.vmem [shape: f32[1,16], index: 10, kind: input, shape index: {}]   ;;  %s4815_s11 = inlined_call_operand.vmem [shape: f32[1,16], index: 11, kind: input, shape index: {}]   ;;  %s4816_s12 = inlined_call_operand.vmem [shape: bf16[4,16], index: 12, kind: input, shape index: {}]   ;;  %s4817_s13 = inlined_call_operand.vmem [shape: f32[1,16], index: 13, kind: input, shape index: {}]   ;;  %s4818_s14 = inlined_call_operand.vmem [shape: f32[1,16], index: 14, kind: input, shape index: {}]   ;;  %s4819_s15 = inlined_call_operand.hbm [shape: f32[2,16,16,16], index: 15, kind: output, shape index: {}]  }
   0x1   :  { %4831 = sst [smem:[#allocation17_spill]] %s4804_s0 }
   0x2   :  { %4832 = sst [smem:[#allocation18_spill]] %s4807_s3 }
   0x3   :  { %4833 = sst [smem:[#allocation19_spill]] %s4815_s11 }
   0x4   :  { %4834 = sst [smem:[#allocation20_spill]] %s4819_s15 }
   0x5   :  { %20 = vsyncpa [#allocation5], 0 }
   0x6   :  { %22 = vsyncpa [#allocation5 + $0x1], 0  ;;  %s3873_s18 = smov 0   ;;  %s3875_s19 = smov 0  }
   0x7   :  { %s3877_s20 = smov 0   ;;  %s3879_s21 = smov 0  }
   0x8   :  { %s3881_s22 = smov 0   ;;  %s3883_s23 = smov 0  }
   0x9   :  { %s3885_s24 = smov 0   ;;  %s3887_s25 = smov 0  }
   0xa LB: > { %4835 = sst [smem:[#allocation7_spill]] %s3758_s18  ;;  %s3156_s26 = sadd.s32 4294967295, %s3786_s25   ;;  %s3786_s25 = sphi %s3887_s25, %s28_s25   ;;  %s3782_s24 = sphi %s3885_s24, %s4885_s24   ;;  %s3778_s23 = sphi %s3883_s23, %s4884_s23   ;;  %s3774_s22 = sphi %s3881_s22, %s4883_s22   ;;  %s3770_s21 = sphi %s3879_s21, %s4882_s21   ;;  %s3766_s20 = sphi %s3877_s20, %s4881_s20   ;;  %s3762_s19 = sphi %s3875_s19, %s4887_s19   ;;  %s3758_s18 = sphi %s3873_s18, %s4886_s18  }
   0xb   : > { %4836 = sst [smem:[#allocation8_spill]] %s3766_s20  ;;  %s3157_s27 = sadd.s32 4294967294, %s3786_s25  }
   0xc   : > { %4837 = sst [smem:[#allocation9_spill]] %s3778_s23  ;;  %s37_s28 = sadd.s32 1, %s3778_s23 }
   0xd   : > { %4838 = sst [smem:[#allocation10_spill]] %s3782_s24  ;;  %p38_p0 = scmp.ge.s32.totalorder %s37_s28, 3 }
   0xe   : > { %4839 = sst [smem:[#allocation11_spill]] %s3786_s25  ;;  %s40_s29 = sadd.s32 1, %s3782_s24 }
   0xf   : > { %p403_p1 = scmp.ne.s32.totalorder %s3766_s20, %s3762_s19  ;;  %p404_p2 = scmp.eq.s32.totalorder %s3156_s26, 5 }
  0x10   : > { %s4889_s28 = smov (%p38_p0, %s37_s28), 0  ;;  %s4891_s29 = smov (!%p38_p0, %s40_s29), %s3782_s24 }
  0x11   : > { %4840 = sst [smem:[#allocation12_spill]] %s4889_s28  ;;  %s389_s30 = ssub.s32 %s3778_s23, %s4889_s28 }
  0x12   : > { %p3924_p3 = por %p404_p2, %p403_p1  ;;  %p42_p4 = scmp.ge.s32.totalorder %s4891_s29, 2 }
  0x13   : > { %p409_p5 = scmp.ne.s32.totalorder %s3762_s19, %s3758_s18  ;;  %p410_p6 = scmp.eq.s32.totalorder %s3157_s27, 5 }
  0x14   : > { %s4841_s16 = scalar_select %p3924_p3, 1, 0 }
  0x15   : > { %p3160_p7 = scmp.ge.s32.totalorder %s3786_s25, 1  ;;  %s4893_s29 = smov (%p42_p4, %s4891_s29), 0 }
  0x16   : > { %4842 = sst [smem:[#allocation13_spill]] %s4841_s16  ;;  %p3933_p8 = por %p410_p6, %p409_p5 }
  0x17   : > { %4843 = sst [smem:[#allocation14_spill]] %s4893_s29  ;;  %p520_p9 = scmp.lt.s32.totalorder %s3786_s25, 7 }
  0x18   : > { %s4844_s17 = scalar_select %p3933_p8, 1, 0 }
  0x19   : > { %s388_s26 = ssub.s32 %s3782_s24, %s4893_s29  ;;  %s393_s15 = sadd.s32 1, %s3766_s20 }
  0x1a   : > { %4845 = sst [smem:[#allocation15_spill]] %s4844_s17  ;;  %s390_s11 = sor.u32 %s389_s30, %s388_s26 }
  0x1b   : > { %p521_p10 = pnand %p3160_p7, %p520_p9  ;;  %p391_p11 = scmp.eq.s32.totalorder %s390_s11, 0 }
  0x1c   : > { %s4847_s3 = sld [smem:[#allocation18_spill]] (!%p521_p10)  ;;  %vm716_vm0 = vcmask (!%p521_p10), 1041408   ;;  %s3951_s29 = smul.u32 (!%p521_p10), 6, %s3770_s21  ;;  %vm697_vm1 = vcmask (!%p521_p10), 31744   ;;  %v4002_v15 = vld [vmem:[%s4808_s4] ss:$0 sm:$0xff] (!%p521_p10) }
  0x1d   : > { %s3942_s28 = scalar_select %p391_p11, %s3766_s20, %s393_s15  }
  0x1e   : > { %524 = sbr.rel (%p521_p10) target bundleno = 1027 (0x403), region = 80  ;;  %p606_p12 = scmp.lt.s32.totalorder (!%p521_p10), %s3774_s22, 1  ;;  %v852_v12 = vstv (!%p521_p10), %s3951_s29  ;;  %v4008_v18 = vld [vmem:[%s4809_s5] ss:$0 sm:$0xff] (!%p521_p10)  ;;  %vm936_vm11 = vsmask.f32 (!%p521_p10), 256 }
  0x1f   : > { %4846 = sst [smem:[#allocation16_spill]] %s3942_s28  ;;  %p608_p13 = scmp.lt.s32.totalorder (!%p521_p10), %s3951_s29, 19  ;;  %v853_v14 = vadd.s32 (!%p521_p10), 1, %v852_v12  ;;  %vm858_vm4 = vcmp.ge.s32.totalorder (!%p521_p10), %v852_v12, 1  ;;  %vm864_vm5 = vcmp.le.s32.totalorder (!%p521_p10), %v852_v12, 16  ;;  %vm1059_vm12 = vcmask (!%p521_p10), 27648  }
  0x20   : > { %s3960_s11 = sadd.s32 (!%p521_p10), 6, %s3951_s29  ;;  %s635_s16 = sadd.s32 (!%p521_p10), 7, %s3951_s29  ;;  %vm1060_vm13 = vsmask.f32 (!%p521_p10), 7938  ;;  %vm1067_vm14 = vcmask (!%p521_p10), 24576   ;;  %vm4024_vm15 = vmand (!%p521_p10), %vm858_vm4, %vm864_vm5  ;;  %v4029_v32 = vadd.s32 (!%p521_p10), 3, %v852_v12 }
  0x21   : > { %p625_p0 = scmp.lt.s32.totalorder (!%p521_p10), %s3960_s11, 19  ;;  %p638_p1 = scmp.lt.s32.totalorder (!%p521_p10), %s635_s16, 19  ;;  %v3997_v13 = vstv (!%p521_p10), %s3960_s11  ;;  %vm859_vm2 = vcmp.ge.s32.totalorder (!%p521_p10), %v853_v14, 1  ;;  %vm865_vm3 = vcmp.le.s32.totalorder (!%p521_p10), %v853_v14, 16  ;;  %v4032_v36 = vadd.s32 (!%p521_p10), 2, %v852_v12  ;;  %vm4077_vm5 = vmand (!%p521_p10), %vm1059_vm12, %vm1060_vm13 }
  0x22   : > { %v666_v0 = vld [vmem:[%s4847_s3] sm:$0x3] (!%p521_p10)  ;;  %s4848_s0 = sld [smem:[#allocation17_spill]] (!%p521_p10)  ;;  %v1208_v16 = vadd.s32 (!%p521_p10), 1, %v3997_v13  ;;  %vm1209_vm8 = vcmp.ge.s32.totalorder (!%p521_p10), %v3997_v13, 1  ;;  %vm1211_vm9 = vcmp.le.s32.totalorder (!%p521_p10), %v3997_v13, 16  ;;  %vm4016_vm10 = vmand (!%p521_p10), %vm859_vm2, %vm865_vm3 }
  0x23   : > { %v1111_v1 = vld [vmem:[%s4847_s3] sm:$0x3] (!%p521_p10)  ;;  %3502 = vmatprep.subr.msk.bf16.mxu0 (!%p521_p10), %vm716_vm0, %v666_v0  ;;  %v718_v2 = vsel (!%p521_p10), %vm716_vm0, %v666_v0, 0  ;;  %vm937_vm2 = vsmask.f32 (!%p521_p10), 4368  ;;  %v4034_v37 = vadd.s32 (!%p521_p10), 5, %v852_v12  ;;  %vm4071_vm4 = vmand (!%p521_p10), %vm1209_vm8, %vm1211_vm9 }
  0x24   : > { %3503 = vmatprep.subr.msk.bf16.mxu1 (!%p521_p10), %vm716_vm0, %v1111_v1  ;;  %v1129_v3 = vsel (!%p521_p10), %vm716_vm0, %v1111_v1, 0  ;;  %3413 = vmatpush3.bf16.msra.mxu0 (!%p521_p10), %v718_v2  ;;  %vm1210_vm6 = vcmp.ge.s32.totalorder (!%p521_p10), %v1208_v16, 1  ;;  %vm1212_vm7 = vcmp.le.s32.totalorder (!%p521_p10), %v1208_v16, 16  ;;  %v4039_v42 = vadd.s32 (!%p521_p10), 4, %v852_v12  ;;  %v1062_v16 = vld [vmem:[#allocation2] sm:$0xf] (!%p521_p10) }
  0x25   : > { %3427 = vmatpush3.bf16.msra.mxu1 %v1129_v3  ;;  %s607_s15 = scalar_select %p606_p12, %s3774_s22, 1  ;;  %vm4056_vm3 = vmand %vm1210_vm6, %vm1212_vm7  ;;  %vm861_vm6 = vcmp.ge.s32.totalorder %v4029_v32, 1  ;;  %vm867_vm7 = vcmp.le.s32.totalorder %v4029_v32, 16  ;;  %vm860_vm8 = vcmp.ge.s32.totalorder %v4032_v36, 1  ;;  %vm866_vm9 = vcmp.le.s32.totalorder %v4032_v36, 16 }
  0x26   : > { %s609_s18 = scalar_select %p608_p13, %s3951_s29, 19  ;;  %v1076_v30 = vld [vmem:[#allocation2 + $0x14] sm:$0x1] }
  0x27   : > { %s3510_s23 = smul.u32 40, %s607_s15  ;;  %s4895_s16 = smov (!%p638_p1, %s635_s16), 19 }
  0x28   : > { %s3161_s30 = sshll.u32 %s609_s18, 1  ;;  %s3165_s3 = sshll.u32 %s4895_s16, 1 }
  0x29   : > { %s612_s26 = sadd.s32 %s3510_s23, %s3161_s30  ;;  %s642_s30 = sadd.s32 %s3510_s23, %s3165_s3 }
  0x2a   : > { %s3162_s27 = sshll.u32 %s612_s26, 2  ;;  %s3166_s17 = sshll.u32 %s642_s30, 2 }
  0x2b   : > { %s3969_s28 = scalar_lea.vmem %s4848_s0, %s3162_s27  ;;  %s4873_s25 = sld [smem:[#allocation19_spill]] }
  0x2c   : > { %v3585_v4 = vld [vmem:[%s3969_s28] sm:$0xff]   ;;  %s626_s20 = scalar_select %p625_p0, %s3960_s11, 19  ;;  %v3586_v5 = vld [vmem:[%s3969_s28 + $0x8] sm:$0xff]   ;;  %v3589_v6 = vld [vmem:[%s3969_s28 + $0x10] sm:$0xff]  }
  0x2d   : > { %3414 = vmatprep.mubr.msk.bf16.mxu0 %vm697_vm1, %v3585_v4  ;;  %v3590_v7 = vld [vmem:[%s3969_s28 + $0x18] sm:$0xff]   ;;  %v3591_v10 = vld [vmem:[%s3969_s28 + $0x20] sm:$0xff]   ;;  %v3592_v11 = vld [vmem:[%s3969_s28 + $0x28] sm:$0xff]   ;;  %s3788_s11 = smov 4  }
  0x2e   : > { %s3163_s15 = sshll.u32 %s626_s20, 1  ;;  %3415 = vmatmul.mubr.msk.bf16.vlgmr.msra.gmra.mrb[0].mxu0 %vm697_vm1, %v3586_v5 }
  0x2f   : > { %s629_s18 = sadd.s32 %s3510_s23, %s3163_s15  ;;  %3418 = vmatprep.mubr.msk.bf16.mxu0 %vm697_vm1, %v3589_v6  ;;  %s644_s15 = scalar_lea.vmem %s4806_s2, %s3166_s17 }
  0x30   : > { %s3164_s24 = sshll.u32 %s629_s18, 2  ;;  %v3588_v9 = vld [vmem:[%s644_s15] sm:$0xff]   ;;  %s3789_s18 = smov 8  }
  0x31   : > { %s3981_s0 = scalar_lea.vmem %s4805_s1, %s3164_s24 }
  0x32   : > { %v3587_v8 = vld [vmem:[%s3981_s0] sm:$0xff]  }
  0x33   : > { %3428 = vmatprep.mubr.msk.bf16.mxu1 %vm697_vm1, %v3587_v8  ;;  %v1072_v8 = vld [vmem:[#allocation2 + $0xc] sm:$0xf] }
  0x34   : > { %3429 = vmatmul.mubr.msk.bf16.vlgmr.msra.gmra.mrb[0].mxu1 %vm697_vm1, %v3588_v9 }
  0x36   : > { %3419 = vmatmul.mubr.msk.bf16.gmra.mrb[4].mxu0 %vm697_vm1, %v3590_v7 }
  0x37   : > { %3422 = vmatprep.mubr.msk.bf16.mxu0 %vm697_vm1, %v3591_v10 }
  0x3e   : > { %3423 = vmatmul.mubr.msk.bf16.gmra.mrb[8].mxu0 %vm697_vm1, %v3592_v11 }
 0x101   : > { %v3416_v17 = vpop.f32.mrb[0].mxu0 }
 0x102   : > { %v810_v19 = vmul.f32 %v3416_v17, %v4002_v15  ;;  %v754_v20 = vpop.f32.mrb[1].mxu0 }
 0x103   : > { %v808_v21 = vmul.f32 %v4002_v15, %v754_v20  ;;  %v3417_v22 = vpop.f32.mrb[2].mxu0 }
 0x104   : > { %v829_v23 = vadd.f32 %v4008_v18, %v810_v19  ;;  %v811_v24 = vmul.f32 %v3417_v22, %v4002_v15  ;;  %v757_v25 = vpop.f32.mrb[3].mxu0 }
 0x105   : > { %v827_v27 = vadd.f32 %v4008_v18, %v808_v21  ;;  %v809_v28 = vmul.f32 %v4002_v15, %v757_v25 }
 0x106   : > { %v841_v29 = vmax.f32 %v829_v23, 0.0  ;;  %v830_v31 = vadd.f32 %v4008_v18, %v811_v24 }
 0x107   : > { %v839_v33 = vmax.f32 %v827_v27, 0.0  ;;  %v3430_v34 = vpop.f32.mrb[0].mxu1  ;;  %v828_v35 = vadd.f32 %v4008_v18, %v809_v28 }
 0x108   : > { %v890_v38 = vsel %vm4016_vm10, %v841_v29, 0.0  ;;  %v1189_v39 = vmul.f32 %v3430_v34, %v4002_v15  ;;  %v842_v40 = vmax.f32 %v830_v31, 0.0  ;;  %v1165_v41 = vpop.f32.mrb[1].mxu1 }
 0x109   : > { %v3349_v43 = vpack.c.bf16 %v890_v38, %v890_v38  ;;  %v888_v44 = vsel %vm4024_vm15, %v839_v33, 0.0  ;;  %v1187_v45 = vmul.f32 %v4002_v15, %v1165_v41  ;;  %v840_v46 = vmax.f32 %v828_v35, 0.0  ;;  %v3431_v47 = vpop.f32.mrb[2].mxu1  ;;  %v4044_v48 = vpop.f32.mrb[4].mxu0 }
 0x10a   : > { %v3347_v49 = vpack.c.bf16 %v888_v44, %v888_v44  ;;  %v1200_v50 = vadd.f32 %v4008_v18, %v1189_v39  ;;  %v891_v51 = vsel %vm4016_vm10, %v842_v40, 0.0  ;;  %v1190_v52 = vmul.f32 %v3431_v47, %v4002_v15  ;;  %v4050_v53 = vpop.f32.mrb[3].mxu1  ;;  %v4052_v54 = vpop.f32.mrb[5].mxu0  ;;  %vm4090_vm10 = vmor %vm936_vm11, %vm937_vm2  ;;  %v1069_v44 = vld [vmem:[#allocation2 + $0x8] sm:$0x1] }
 0x10b   : > { %v957_v55 = vshrl.u32 %v3349_v43, 16  ;;  %v960_v56 = vshll.u32 %v3349_v43, 16  ;;  %v3350_v58 = vpack.c.bf16 %v891_v51, %v891_v51  ;;  %v1198_v59 = vadd.f32 %v4008_v18, %v1187_v45  ;;  %v4061_v60 = vpop.f32.mrb[6].mxu0  ;;  %v1283_v47 = vld [vmem:[#allocation2 + $0x54] sm:$0xf] }
 0x10c   : > { %v940_v61 = vshrl.u32 %v3347_v49, 16  ;;  %v943_v62 = vshll.u32 %v3347_v49, 16  ;;  %v1204_v63 = vmax.f32 %v1200_v50, 0.0  ;;  %v889_v0 = vsel %vm4024_vm15, %v840_v46, 0.0  ;;  %v4065_v1 = vpop.f32.mrb[7].mxu0  ;;  %vm4098_vm15 = vmand %vm1067_vm14, %vm936_vm11 }
 0x10d   : > { %v959_v2 = vrot.slane %v957_v55, 7  ;;  %v965_v3 = vshrl.u32 %v3350_v58, 16  ;;  %v968_v4 = vshll.u32 %v3350_v58, 16  ;;  %v1202_v5 = vmax.f32 %v1198_v59, 0.0  ;;  %vm4141_vm11 = vmand %vm1067_vm14, %vm1060_vm13 }
 0x10e   : > { %v942_v9 = vrot.slane %v940_v61, 7  ;;  %v1221_v10 = vsel %vm4056_vm3, %v1204_v63, 0.0  ;;  %v3348_v11 = vpack.c.bf16 %v889_v0, %v889_v0  ;;  %v1201_v12 = vadd.f32 %v4008_v18, %v1190_v52  ;;  %vm4154_vm13 = vmand %vm861_vm6, %vm867_vm7 }
 0x10f   : > { %v962_v13 = vor.u32 %v960_v56, %v959_v2  ;;  %v963_v14 = vrot.slane %v959_v2, 4  ;;  %v3361_v17 = vpack.c.bf16 %v1221_v10, %v1221_v10  ;;  %v967_v19 = vrot.slane %v965_v3, 7  ;;  %vm4169_vm14 = vmand %vm860_vm8, %vm866_vm9 }
 0x110   : > { %v945_v20 = vor.u32 %v943_v62, %v942_v9  ;;  %v946_v21 = vrot.slane %v942_v9, 4  ;;  %v1219_v23 = vsel %vm4071_vm4, %v1202_v5, 0.0  ;;  %v948_v24 = vshrl.u32 %v3348_v11, 16 }
 0x111   : > { %v1073_v26 = vsel %vm4077_vm5, %v962_v13, %v1072_v8  ;;  %v1253_v27 = vshrl.u32 %v3361_v17, 16  ;;  %v1256_v28 = vshll.u32 %v3361_v17, 16  ;;  %v970_v29 = vor.u32 %v968_v4, %v967_v19  ;;  %v4104_v31 = vpop.f32.mrb[8].mxu0  ;;  %v1276_v4 = vld [vmem:[#allocation2 + $0x48] sm:$0xf] }
 0x112   : > { %1074 = vst [vmem:[#allocation2 + $0xc] sm:$0xf] %v1073_v26  ;;  %v1063_v33 = vsel %vm4077_vm5, %v945_v20, %v1062_v16  ;;  %v972_v34 = vrot.slane %v967_v19, 4  ;;  %v3359_v35 = vpack.c.bf16 %v1219_v23, %v1219_v23  ;;  %v950_v38 = vrot.slane %v948_v24, 7  ;;  %v4108_v39 = vpop.f32.mrb[9].mxu0 }
 0x113   : > { %1064 = vst [vmem:[#allocation2] sm:$0xf] %v1063_v33  ;;  %v4110_v40 = vrot.slane %v1253_v27, 7  ;;  %v971_v41 = vsel %vm4090_vm10, %v963_v14, %v970_v29  ;;  %v951_v43 = vshll.u32 %v3348_v11, 16  ;;  %v1205_v45 = vmax.f32 %v1201_v12, 0.0  ;;  %v4114_v46 = vpop.f32.mrb[10].mxu0 }
 0x114   : > { %1075 = vst.msk [vmem:[#allocation2 + $0x10] sm:$0xf] %vm1059_vm12, %v971_v41  ;;  %v1077_v49 = vsel %vm4098_vm15, %v972_v34, %v1076_v30  ;;  %v1236_v50 = vshrl.u32 %v3359_v35, 16  ;;  %v1239_v51 = vshll.u32 %v3359_v35, 16  ;;  %v955_v52 = vrot.slane %v950_v38, 4  ;;  %v4119_v55 = vpop.f32.mrb[11].mxu0 }
 0x115   : > { %v1258_v56 = vor.u32 %v1256_v28, %v4110_v40  ;;  %v1259_v58 = vrot.slane %v4110_v40, 4  ;;  %1078 = vst [vmem:[#allocation2 + $0x14] sm:$0x1] %v1077_v49  ;;  %v953_v59 = vor.u32 %v951_v43, %v950_v38  ;;  %v1222_v61 = vsel %vm4056_vm3, %v1205_v45, 0.0  ;;  %v1287_v24 = vld [vmem:[#allocation2 + $0x5c] sm:$0x1] }
 0x116   : > { %v4125_v62 = vrot.slane %v1236_v50, 7  ;;  %v1070_v63 = vsel %vm4098_vm15, %v955_v52, %v1069_v44  ;;  %v3362_v0 = vpack.c.bf16 %v1222_v61, %v1222_v61  ;;  %v1188_v2 = vmul.f32 %v4002_v15, %v4050_v53 }
 0x117   : > { %v1284_v3 = vsel %vm4077_vm5, %v1258_v56, %v1283_v47  ;;  %v954_v5 = vsel %vm4090_vm10, %v946_v21, %v953_v59  ;;  %1071 = vst [vmem:[#allocation2 + $0x8] sm:$0x1] %v1070_v63  ;;  %v814_v57 = vmul.f32 %v4044_v48, %v4002_v15  ;;  %v812_v8 = vmul.f32 %v4002_v15, %v4052_v54 }
 0x118   : > { %1285 = vst [vmem:[#allocation2 + $0x54] sm:$0xf] %v1284_v3  ;;  %v1241_v53 = vor.u32 %v1239_v51, %v4125_v62  ;;  %v1242_v10 = vrot.slane %v4125_v62, 4  ;;  %1066 = vst.msk [vmem:[#allocation2 + $0x4] sm:$0xf] %vm1059_vm12, %v954_v5  ;;  %v1261_v11 = vshrl.u32 %v3362_v0, 16  ;;  %v1199_v48 = vadd.f32 %v4008_v18, %v1188_v2 }
 0x119   : > { %v1264_v12 = vshll.u32 %v3362_v0, 16  ;;  %v1293_v13 = vld [vmem:[#allocation2 + $0xc] sm:$0x1]  ;;  %v833_v54 = vadd.f32 %v4008_v18, %v814_v57  ;;  %v831_v16 = vadd.f32 %v4008_v18, %v812_v8  ;;  %v815_v17 = vmul.f32 %v4061_v60, %v4002_v15  ;;  %v1280_v0 = vld [vmem:[#allocation2 + $0x50] sm:$0x1] }
 0x11a   : > { %v1294_v19 = vsel %vm4098_vm15, 0, %v1293_v13  ;;  %v1290_v20 = vld [vmem:[#allocation2] sm:$0x1]  ;;  %v1277_v21 = vsel %vm4077_vm5, %v1241_v53, %v1276_v4  ;;  %v1263_v23 = vrot.slane %v1261_v11, 7  ;;  %v813_v60 = vmul.f32 %v4002_v15, %v4065_v1  ;;  %v1086_v3 = vld [vmem:[#allocation2 + $0x24] sm:$0xf] }
 0x11b   : > { %1295 = vst [vmem:[#allocation2 + $0xc] sm:$0x1] %v1294_v19  ;;  %v1291_v26 = vsel %vm4098_vm15, 0, %v1290_v20  ;;  %1278 = vst [vmem:[#allocation2 + $0x48] sm:$0xf] %v1277_v21  ;;  %v1203_v27 = vmax.f32 %v1199_v48, 0.0  ;;  %v834_v36 = vadd.f32 %v4008_v18, %v815_v17  ;;  %v818_v19 = vmul.f32 %v4104_v31, %v4002_v15 }
 0x11c   : > { %v845_v28 = vmax.f32 %v833_v54, 0.0  ;;  %v843_v29 = vmax.f32 %v831_v16, 0.0  ;;  %1292 = vst [vmem:[#allocation2] sm:$0x1] %v1291_v26  ;;  %v1318_v30 = vld [vmem:[#allocation2 + $0x14] sm:$0x1]  ;;  %v1266_v33 = vor.u32 %v1264_v12, %v1263_v23  ;;  %v832_v35 = vadd.f32 %v4008_v18, %v813_v60 }
 0x11d   : > { %v1268_v34 = vrot.slane %v1263_v23, 4  ;;  %v1319_v38 = vsel %vm4141_vm11, 0, %v1318_v30  ;;  %v1220_v1 = vsel %vm4071_vm4, %v1203_v27, 0.0  ;;  %vm863_vm2 = vcmp.ge.s32.totalorder %v4034_v37, 1 }
 0x11e   : > { %v894_v40 = vsel %vm4154_vm13, %v845_v28, 0.0  ;;  %v892_v41 = vsel %vm4169_vm14, %v843_v29, 0.0  ;;  %1320 = vst [vmem:[#allocation2 + $0x14] sm:$0x1] %v1319_v38  ;;  %v1315_v43 = vld [vmem:[#allocation2 + $0x8] sm:$0x1]  ;;  %v1267_v44 = vsel %vm4090_vm10, %v1259_v58, %v1266_v33  ;;  %v3360_v47 = vpack.c.bf16 %v1220_v1, %v1220_v1 }
 0x11f   : > { %v1288_v45 = vsel %vm4098_vm15, %v1268_v34, %v1287_v24  ;;  %v3353_v49 = vpack.c.bf16 %v894_v40, %v894_v40  ;;  %vm869_vm3 = vcmp.le.s32.totalorder %v4034_v37, 16  ;;  %v1311_v6 = vld [vmem:[#allocation2 + $0x54] sm:$0x1]  ;;  %v1316_v50 = vsel %vm4141_vm11, 0, %v1315_v43  ;;  %1286 = vst.msk [vmem:[#allocation2 + $0x58] sm:$0xf] %vm1059_vm12, %v1267_v44 }
 0x120   : > { %1289 = vst [vmem:[#allocation2 + $0x5c] sm:$0x1] %v1288_v45  ;;  %v3351_v51 = vpack.c.bf16 %v892_v41, %v892_v41  ;;  %v846_v52 = vmax.f32 %v834_v36, 0.0  ;;  %v844_v56 = vmax.f32 %v832_v35, 0.0  ;;  %v1312_v58 = vsel %vm4098_vm15, 0, %v1311_v6  ;;  %vm4231_vm6 = vmand %vm863_vm2, %vm869_vm3 }
 0x121   : > { %1317 = vst [vmem:[#allocation2 + $0x8] sm:$0x1] %v1316_v50  ;;  %v1244_v59 = vshrl.u32 %v3360_v47, 16  ;;  %v1247_v61 = vshll.u32 %v3360_v47, 16  ;;  %v991_v63 = vshrl.u32 %v3353_v49, 16  ;;  %v994_v2 = vshll.u32 %v3353_v49, 16 }
 0x122   : > { %1313 = vst [vmem:[#allocation2 + $0x54] sm:$0x1] %v1312_v58  ;;  %v974_v4 = vshrl.u32 %v3351_v51, 16  ;;  %v977_v5 = vshll.u32 %v3351_v51, 16  ;;  %v895_v57 = vsel %vm4154_vm13, %v846_v52, 0.0  ;;  %v893_v13 = vsel %vm4169_vm14, %v844_v56, 0.0 }
 0x123   : > { %v1308_v8 = vld [vmem:[#allocation2 + $0x48] sm:$0x1]  ;;  %v1246_v53 = vrot.slane %v1244_v59, 7  ;;  %v993_v11 = vrot.slane %v991_v63, 7  ;;  %v3354_v12 = vpack.c.bf16 %v895_v57, %v895_v57  ;;  %v3593_v48 = vld [vmem:[#allocation2 + $0xc] sm:$0xff]   ;;  %vm862_vm4 = vcmp.ge.s32.totalorder %v4039_v42, 1 }
 0x124   : > { %v1309_v54 = vsel %vm4098_vm15, 0, %v1308_v8  ;;  %v976_v16 = vrot.slane %v974_v4, 7  ;;  %v3352_v17 = vpack.c.bf16 %v893_v13, %v893_v13  ;;  %v1079_v24 = vld [vmem:[#allocation2 + $0x18] sm:$0xf]  ;;  %1437 = vrot.lane.b32.xlu0 %v3593_v48, %s3788_s11  ;;  %v1090_v33 = vld [vmem:[#allocation2 + $0x2c] sm:$0x1]  ;;  %v837_v41 = vadd.f32 %v4008_v18, %v818_v19 }
 0x125   : > { %1310 = vst [vmem:[#allocation2 + $0x48] sm:$0x1] %v1309_v54  ;;  %v1249_v14 = vor.u32 %v1247_v61, %v1246_v53  ;;  %v1251_v20 = vrot.slane %v1246_v53, 4  ;;  %v996_v21 = vor.u32 %v994_v2, %v993_v11  ;;  %v997_v23 = vrot.slane %v993_v11, 4  ;;  %v3595_v36 = vld [vmem:[#allocation2 + $0xc] sm:$0xff]  }
 0x126   : > { %v979_v32 = vor.u32 %v977_v5, %v976_v16  ;;  %v980_v60 = vrot.slane %v976_v16, 4  ;;  %v999_v26 = vshrl.u32 %v3354_v12, 16  ;;  %v1002_v27 = vshll.u32 %v3354_v12, 16  ;;  %v1083_v1 = vld [vmem:[#allocation2 + $0x20] sm:$0x1]  ;;  %v3597_v51 = vld [vmem:[#allocation2 + $0xc] sm:$0xff]  }
 0x127   : > { %v1336_v28 = vld [vmem:[#allocation2 + $0x5c] sm:$0x1]  ;;  %v1250_v29 = vsel %vm4090_vm10, %v1242_v10, %v1249_v14  ;;  %v1281_v31 = vsel %vm4098_vm15, %v1251_v20, %v1280_v0  ;;  %v1087_v30 = vsel %vm4077_vm5, %v996_v21, %v1086_v3  ;;  %v982_v34 = vshrl.u32 %v3352_v17, 16 }
 0x128   : > { %v1337_v35 = vsel %vm4141_vm11, 0, %v1336_v28  ;;  %1279 = vst.msk [vmem:[#allocation2 + $0x4c] sm:$0xf] %vm1059_vm12, %v1250_v29  ;;  %1282 = vst [vmem:[#allocation2 + $0x50] sm:$0x1] %v1281_v31  ;;  %v1080_v62 = vsel %vm4077_vm5, %v979_v32, %v1079_v24  ;;  %v1001_v10 = vrot.slane %v999_v26, 7  ;;  %1789 = vrot.lane.b32.xlu0 %v3595_v36, %s3788_s11  ;;  %v816_v43 = vmul.f32 %v4002_v15, %v4108_v39 }
 0x129   : > { %1088 = vst [vmem:[#allocation2 + $0x24] sm:$0xf] %v1087_v30  ;;  %v985_v38 = vshll.u32 %v3352_v17, 16  ;;  %1338 = vst [vmem:[#allocation2 + $0x5c] sm:$0x1] %v1337_v35  ;;  %v984_v40 = vrot.slane %v982_v34, 7  ;;  %v819_v44 = vmul.f32 %v4114_v46, %v4002_v15  ;;  %v817_v6 = vmul.f32 %v4002_v15, %v4119_v55 }
 0x12a   : > { %1081 = vst [vmem:[#allocation2 + $0x18] sm:$0xf] %v1080_v62  ;;  %v1004_v45 = vor.u32 %v1002_v27, %v1001_v10  ;;  %v1006_v47 = vrot.slane %v1001_v10, 4  ;;  %vm868_vm7 = vcmp.le.s32.totalorder %v4039_v42, 16  ;;  %v849_v52 = vmax.f32 %v837_v41, 0.0  ;;  %v3599_v59 = vld [vmem:[#allocation2 + $0x54] sm:$0xff]  }
 0x12b   : > { %v987_v50 = vor.u32 %v985_v38, %v984_v40  ;;  %v989_v39 = vrot.slane %v984_v40, 4  ;;  %v835_v46 = vadd.f32 %v4008_v18, %v816_v43  ;;  %v838_v58 = vadd.f32 %v4008_v18, %v819_v44  ;;  %vm4257_vm8 = vmand %vm862_vm4, %vm868_vm7  ;;  %v3601_v48 = vld [vmem:[#allocation2 + $0x54] sm:$0xff]   ;;  %v1100_v16 = vld [vmem:[#allocation2 + $0x3c] sm:$0xf] }
 0x12c   : > { %v1005_v56 = vsel %vm4090_vm10, %v997_v23, %v1004_v45  ;;  %v1091_v37 = vsel %vm4098_vm15, %v1006_v47, %v1090_v33  ;;  %2302 = vrot.lane.b32.xlu0 %v3597_v51, %s3788_s11  ;;  %v898_v61 = vsel %vm4231_vm6, %v849_v52, 0.0  ;;  %v836_v4 = vadd.f32 %v4008_v18, %v817_v6  ;;  %v3596_v18 = vld [vmem:[#allocation2 + $0x14] ss:$0 sps:$4 sm:$0x11]   ;;  %v1093_v62 = vld [vmem:[#allocation2 + $0x30] sm:$0xf] }
 0x12d   : > { %1089 = vst.msk [vmem:[#allocation2 + $0x28] sm:$0xf] %vm1059_vm12, %v1005_v56  ;;  %1092 = vst [vmem:[#allocation2 + $0x2c] sm:$0x1] %v1091_v37  ;;  %v988_v15 = vsel %vm4090_vm10, %v980_v60, %v987_v50  ;;  %v1084_v55 = vsel %vm4098_vm15, %v989_v39, %v1083_v1  ;;  %v3357_v63 = vpack.c.bf16 %v898_v61, %v898_v61  ;;  %v847_v0 = vmax.f32 %v835_v46, 0.0 }
 0x12e   : > { %1082 = vst.msk [vmem:[#allocation2 + $0x1c] sm:$0xf] %vm1059_vm12, %v988_v15  ;;  %1085 = vst [vmem:[#allocation2 + $0x20] sm:$0x1] %v1084_v55  ;;  %v850_v3 = vmax.f32 %v838_v58, 0.0  ;;  %v848_v19 = vmax.f32 %v836_v4, 0.0 }
 0x12f   : > { %v1333_v5 = vld [vmem:[#allocation2 + $0x50] sm:$0x1]  ;;  %v3594_v12 = vld [vmem:[#allocation2 + $0x48] sm:$0xff]   ;;  %v1025_v13 = vshrl.u32 %v3357_v63, 16  ;;  %v1028_v54 = vshll.u32 %v3357_v63, 16  ;;  %v896_v17 = vsel %vm4257_vm8, %v847_v0, 0.0 }
 0x130   : > { %v1299_v57 = vld [vmem:[#allocation2 + $0x24] sm:$0x1]  ;;  %v1334_v8 = vsel %vm4141_vm11, 0, %v1333_v5  ;;  %1489 = vrot.lane.b32.xlu0 %v3599_v59, %s3789_s18  ;;  %1487 = vrot.lane.b32.xlu1 %v3594_v12, %s3789_s18  ;;  %v3355_v20 = vpack.c.bf16 %v896_v17, %v896_v17  ;;  %v899_v21 = vsel %vm4231_vm6, %v850_v3, 0.0  ;;  %v897_v36 = vsel %vm4257_vm8, %v848_v19, 0.0  ;;  %v3598_v35 = vld [vmem:[#allocation2 + $0x48] sm:$0xff]  }
 0x131   : > { %v1300_v53 = vsel %vm4098_vm15, 0, %v1299_v57  ;;  %v1296_v11 = vld [vmem:[#allocation2 + $0x18] sm:$0x1]  ;;  %1335 = vst [vmem:[#allocation2 + $0x50] sm:$0x1] %v1334_v8  ;;  %v1027_v14 = vrot.slane %v1025_v13, 7  ;;  %v3358_v24 = vpack.c.bf16 %v899_v21, %v899_v21  ;;  %v3356_v38 = vpack.c.bf16 %v897_v36, %v897_v36 }
 0x132   : > { %1301 = vst [vmem:[#allocation2 + $0x24] sm:$0x1] %v1300_v53  ;;  %v1297_v42 = vsel %vm4098_vm15, 0, %v1296_v11  ;;  %v1008_v27 = vshrl.u32 %v3355_v20, 16  ;;  %v1011_v31 = vshll.u32 %v3355_v20, 16  ;;  %v3605_v6 = vld [vmem:[#allocation2 + $0x48] sm:$0xff]  }
 0x133   : > { %1298 = vst [vmem:[#allocation2 + $0x18] sm:$0x1] %v1297_v42  ;;  %v1030_v26 = vor.u32 %v1028_v54, %v1027_v14  ;;  %v3603_v28 = vld [vmem:[#allocation2 + $0x14] ss:$0 sps:$4 sm:$0x11]   ;;  %v1033_v30 = vshrl.u32 %v3358_v24, 16 }
 0x134   : > { %v1324_v23 = vld [vmem:[#allocation2 + $0x2c] sm:$0x1]  ;;  %1881 = vrot.lane.b32.xlu0 %v3601_v48, %s3789_s18  ;;  %2304 = vrot.lane.b32.xlu1 %v3596_v18, %s3788_s11  ;;  %v1010_v34 = vrot.slane %v1008_v27, 7  ;;  %v1036_v10 = vshll.u32 %v3358_v24, 16  ;;  %v1031_v41 = vrot.slane %v1027_v14, 4  ;;  %v1016_v44 = vshrl.u32 %v3356_v38, 16 }
 0x135   : > { %v1325_v32 = vsel %vm4141_vm11, 0, %v1324_v23  ;;  %v1321_v60 = vld [vmem:[#allocation2 + $0x20] sm:$0x1]  ;;  %v1101_v33 = vsel %vm4077_vm5, %v1030_v26, %v1100_v16  ;;  %v3600_v40 = vld [vmem:[#allocation2 + $0x5c] ss:$0 sps:$4 sm:$0x11]  }
 0x136   : > { %1326 = vst [vmem:[#allocation2 + $0x2c] sm:$0x1] %v1325_v32  ;;  %v1322_v29 = vsel %vm4141_vm11, 0, %v1321_v60  ;;  %1102 = vst [vmem:[#allocation2 + $0x3c] sm:$0xf] %v1101_v33  ;;  %v1013_v1 = vor.u32 %v1011_v31, %v1010_v34  ;;  %v1035_v43 = vrot.slane %v1033_v30, 7 }
 0x137   : > { %1323 = vst [vmem:[#allocation2 + $0x20] sm:$0x1] %v1322_v29  ;;  %v1019_v45 = vshll.u32 %v3356_v38, 16  ;;  %v1014_v47 = vrot.slane %v1010_v34, 4  ;;  %v1104_v50 = vld [vmem:[#allocation2 + $0x44] sm:$0x1] }
 0x138   : > { %1791 = vrot.lane.b32.xlu0 %v3603_v28, %s3788_s11  ;;  %1809 = vrot.lane.b32.xlu1 %v3598_v35, %s3788_s11  ;;  %v1094_v49 = vsel %vm4077_vm5, %v1013_v1, %v1093_v62  ;;  %v1038_v39 = vor.u32 %v1036_v10, %v1035_v43  ;;  %v1040_v51 = vrot.slane %v1035_v43, 4  ;;  %v1018_v52 = vrot.slane %v1016_v44, 7  ;;  %v1097_v46 = vld [vmem:[#allocation2 + $0x38] sm:$0x1]  ;;  %v3607_v59 = vld [vmem:[#allocation2 + $0x48] sm:$0xff]  }
 0x139   : > { %1095 = vst [vmem:[#allocation2 + $0x30] sm:$0xf] %v1094_v49  ;;  %v3602_v56 = vld [vmem:[#allocation2 + $0x50] ss:$0 sps:$4 sm:$0x11]   ;;  %v3604_v5 = vld [vmem:[#allocation2 + $0x24] sm:$0xff]  }
 0x13a   : > { %v1039_v37 = vsel %vm4090_vm10, %v1031_v41, %v1038_v39  ;;  %v1105_v58 = vsel %vm4098_vm15, %v1040_v51, %v1104_v50  ;;  %v1021_v7 = vor.u32 %v1019_v45, %v1018_v52  ;;  %v1023_v15 = vrot.slane %v1018_v52, 4  ;;  %v3609_v2 = vld [vmem:[#allocation2 + $0x50] ss:$0 sps:$4 sm:$0x11]   ;;  %v3606_v22 = vld [vmem:[#allocation2 + $0x24] sm:$0xff]   ;;  %v3615_v13 = vld [vmem:[#allocation2 + $0x18] sm:$0xff]  }
 0x13b   : > { %1103 = vst.msk [vmem:[#allocation2 + $0x40] sm:$0xf] %vm1059_vm12, %v1039_v37  ;;  %1106 = vst [vmem:[#allocation2 + $0x44] sm:$0x1] %v1105_v58  ;;  %v3611_v53 = vld [vmem:[#allocation2 + $0x24] sm:$0xff]   ;;  %v3617_v48 = vld [vmem:[#allocation2 + $0x18] sm:$0xff]  }
 0x13c   : > { %1447 = vrot.lane.b32.xlu0 %v3605_v6, %s3788_s11  ;;  %1883 = vrot.lane.b32.xlu1 %v3600_v40, %s3789_s18  ;;  %v1022_v63 = vsel %vm4090_vm10, %v1014_v47, %v1021_v7  ;;  %v1098_v0 = vsel %vm4098_vm15, %v1023_v15, %v1097_v46  ;;  %v3608_v25 = vld [vmem:[#allocation2 + $0x24] sm:$0xff]   ;;  %v3612_v9 = vld [vmem:[#allocation2 + $0x18] sm:$0xff]   ;;  %v3676_v35 = vld [vmem:[%s4810_s6 + $0x10] sm:$0x3f]   ;;  %vm1509_vm5 = vcmask 64512   ;;  %vm1529_vm10 = vcmask 97280  }
 0x13d   : > { %v1305_v55 = vld [vmem:[#allocation2 + $0x3c] sm:$0x1]  ;;  %1096 = vst.msk [vmem:[#allocation2 + $0x34] sm:$0xf] %vm1059_vm12, %v1022_v63  ;;  %1099 = vst [vmem:[#allocation2 + $0x38] sm:$0x1] %v1098_v0 }
 0x13e   : > { %v1306_v61 = vsel %vm4098_vm15, 0, %v1305_v55  ;;  %v3613_v42 = vld [vmem:[#allocation2 + $0x24] sm:$0xff]   ;;  %v3619_v54 = vld [vmem:[#allocation2 + $0x18] sm:$0xff]   ;;  %v3616_v19 = vld [vmem:[#allocation2 + $0x2c] ss:$0 sps:$4 sm:$0x11]  }
 0x13f   : > { %1307 = vst [vmem:[#allocation2 + $0x3c] sm:$0x1] %v1306_v61  ;;  %v3610_v18 = vld [vmem:[#allocation2 + $0x24] sm:$0xff]   ;;  %v3614_v16 = vld [vmem:[#allocation2 + $0x18] sm:$0xff]   ;;  %vm1542_vm12 = vcmask 1045504  }
 0x140   : > { %1877 = vrot.lane.b32.xlu0 %v3607_v59, %s3789_s18  ;;  %1811 = vrot.lane.b32.xlu1 %v3602_v56, %s3788_s11  ;;  %v1302_v3 = vld [vmem:[#allocation2 + $0x30] sm:$0x1]  ;;  %v3621_v17 = vld [vmem:[#allocation2 + $0x18] sm:$0xff]   ;;  %v3618_v14 = vld [vmem:[#allocation2 + $0x2c] ss:$0 sps:$4 sm:$0x11]  }
 0x141   : > { %v1303_v4 = vsel %vm4098_vm15, 0, %v1302_v3  ;;  %v3623_v20 = vld [vmem:[#allocation2 + $0x2c] ss:$0 sps:$4 sm:$0x11]   ;;  %v3664_v60 = vld [vmem:[%s4810_s6] sm:$0x3f]  }
 0x142   : > { %1304 = vst [vmem:[#allocation2 + $0x30] sm:$0x1] %v1303_v4  ;;  %v1330_v57 = vld [vmem:[#allocation2 + $0x44] sm:$0x1]  ;;  %3504 = vmatprep.subr.msk.bf16.mxu1 %vm1542_vm12, %v3664_v60  ;;  %v1544_v28 = vsel %vm1542_vm12, %v3664_v60, 0  ;;  %v4351_v38 = vsel %vm1542_vm12, %v3676_v35, 0 }
 0x143   : > { %v1331_v8 = vsel %vm4141_vm11, 0, %v1330_v57  ;;  %v3620_v21 = vld [vmem:[#allocation2 + $0x20] ss:$0 sps:$4 sm:$0x11]   ;;  %3433 = vmatpush3.bf16.msra.mxu1 %v1544_v28  ;;  %v3673_v30 = vld [vmem:[%s4810_s6 + $0x8] sm:$0x3f]  }
 0x144   : > { %1879 = vrot.lane.b32.xlu0 %v3609_v2, %s3789_s18  ;;  %1481 = vrot.lane.b32.xlu1 %v3604_v5, %s3789_s18  ;;  %1332 = vst [vmem:[#allocation2 + $0x44] sm:$0x1] %v1331_v8  ;;  %v1327_v11 = vld [vmem:[#allocation2 + $0x38] sm:$0x1]  ;;  %v2033_v36 = vsel %vm1542_vm12, %v3673_v30, 0  ;;  %v3647_v39 = vld [vmem:[#allocation2 + $0x48] sm:$0xff]  }
 0x145   : > { %v1328_v12 = vsel %vm4141_vm11, 0, %v1327_v11  ;;  %v3625_v23 = vld [vmem:[#allocation2 + $0x2c] ss:$0 sps:$4 sm:$0x11]   ;;  %3505 = vmatprep.subr.msk.bf16.mxu0 %vm1542_vm12, %v3673_v30  ;;  %3506 = vmatprep.subr.msk.bf16.mxu1 %vm1542_vm12, %v3676_v35  ;;  %v3652_v37 = vld [vmem:[#allocation2 + $0x54] sm:$0xff]   ;;  %vm2470_vm15 = vcmask 1046528  }
 0x146   : > { %1329 = vst [vmem:[#allocation2 + $0x38] sm:$0x1] %v1328_v12  ;;  %v3622_v24 = vld [vmem:[#allocation2 + $0x20] ss:$0 sps:$4 sm:$0x11]   ;;  %3447 = vmatpush3.bf16.msra.mxu0 %v2033_v36  ;;  %v3649_v52 = vld [vmem:[#allocation2 + $0x48] sm:$0xff]  }
 0x147   : > { %v3627_v32 = vld [vmem:[#allocation2 + $0x20] ss:$0 sps:$4 sm:$0x11]   ;;  %v3648_v15 = vld [vmem:[#allocation2 + $0x50] ss:$0 sps:$4 sm:$0x11]  }
 0x148   : > { %1797 = vrot.lane.b32.xlu0 %v3611_v53, %s3788_s11  ;;  %1441 = vrot.lane.b32.xlu1 %v3606_v22, %s3788_s11  ;;  %v3629_v26 = vld [vmem:[#allocation2 + $0x3c] sm:$0xff]   ;;  %v3651_v59 = vld [vmem:[#allocation2 + $0x50] ss:$0 sps:$4 sm:$0x11]   ;;  %vm1945_vm9 = vsmask.f32 7424 }
 0x149   : > { %v3624_v27 = vld [vmem:[#allocation2 + $0x20] ss:$0 sps:$4 sm:$0x11]   ;;  %v3633_v34 = vld [vmem:[#allocation2 + $0x30] sm:$0xff]  }
 0x14a   : > { %v3631_v29 = vld [vmem:[#allocation2 + $0x3c] sm:$0xff]   ;;  %v3635_v62 = vld [vmem:[#allocation2 + $0x30] sm:$0xff]  }
 0x14b   : > { %v3626_v31 = vld [vmem:[#allocation2 + $0x3c] sm:$0xff]   ;;  %v3630_v10 = vld [vmem:[#allocation2 + $0x30] sm:$0xff]   ;;  %v3634_v43 = vld [vmem:[#allocation2 + $0x44] ss:$0 sps:$4 sm:$0x11]  }
 0x14c   : > { %2310 = vrot.lane.b32.xlu0 %v3613_v42, %s3788_s11  ;;  %1865 = vrot.lane.b32.xlu1 %v3608_v25, %s3789_s18  ;;  %v3628_v33 = vld [vmem:[#allocation2 + $0x3c] sm:$0xff]   ;;  %v3637_v1 = vld [vmem:[#allocation2 + $0x30] sm:$0xff]   ;;  %v3636_v45 = vld [vmem:[#allocation2 + $0x44] ss:$0 sps:$4 sm:$0x11]  }
 0x14d   : > { %v3632_v40 = vld [vmem:[#allocation2 + $0x30] sm:$0xff]   ;;  %v3639_v41 = vld [vmem:[#allocation2 + $0x38] ss:$0 sps:$4 sm:$0x11]   ;;  %v3643_v47 = vld [vmem:[#allocation2 + $0x3c] sm:$0xff]  }
 0x14e   : > { %v3641_v44 = vld [vmem:[#allocation2 + $0x30] sm:$0xff]   ;;  %v3638_v49 = vld [vmem:[#allocation2 + $0x38] ss:$0 sps:$4 sm:$0x11]   ;;  %v3645_v6 = vld [vmem:[#allocation2 + $0x3c] sm:$0xff]  }
 0x14f   : > { %v3640_v50 = vld [vmem:[#allocation2 + $0x44] ss:$0 sps:$4 sm:$0x11]   ;;  %v3644_v46 = vld [vmem:[#allocation2 + $0x38] ss:$0 sps:$4 sm:$0x11]  }
 0x150   : > { %1439 = vrot.lane.b32.xlu0 %v3615_v13, %s3788_s11  ;;  %2378 = vrot.lane.b32.xlu1 %v3610_v18, %s3789_s18  ;;  %v3642_v51 = vld [vmem:[#allocation2 + $0x44] ss:$0 sps:$4 sm:$0x11]   ;;  %v3646_v58 = vld [vmem:[#allocation2 + $0x38] ss:$0 sps:$4 sm:$0x11]  }
 0x151   : > { %v3654_v0 = vld [vmem:[#allocation2 + $0x5c] ss:$0 sps:$4 sm:$0x11]  }
 0x152   : > { %v3657_v4 = vld [vmem:[#allocation2 + $0x3c] sm:$0xff]  }
 0x153   : > { %v3660_v53 = vld [vmem:[#allocation2 + $0x3c] sm:$0xff]  }
 0x154   : > { %1793 = vrot.lane.b32.xlu0 %v3617_v48, %s3788_s11  ;;  %1479 = vrot.lane.b32.xlu1 %v3612_v9, %s3789_s18  ;;  %v3658_v48 = vld [vmem:[#allocation2 + $0x44] ss:$0 sps:$4 sm:$0x11]  }
 0x158   : > { %2306 = vrot.lane.b32.xlu0 %v3619_v54, %s3788_s11  ;;  %1861 = vrot.lane.b32.xlu1 %v3614_v16, %s3789_s18 }
 0x15c   : > { %2374 = vrot.lane.b32.xlu0 %v3621_v17, %s3789_s18  ;;  %1867 = vrot.lane.b32.xlu1 %v3616_v19, %s3789_s18 }
 0x160   : > { %1799 = vrot.lane.b32.xlu0 %v3623_v20, %s3788_s11  ;;  %2312 = vrot.lane.b32.xlu1 %v3618_v14, %s3788_s11 }
 0x164   : > { %2380 = vrot.lane.b32.xlu0 %v3625_v23, %s3789_s18  ;;  %1795 = vrot.lane.b32.xlu1 %v3620_v21, %s3788_s11 }
 0x168   : > { %1863 = vrot.lane.b32.xlu0 %v3627_v32, %s3789_s18  ;;  %2308 = vrot.lane.b32.xlu1 %v3622_v24, %s3788_s11 }
 0x16c   : > { %1485 = vrot.lane.b32.xlu0 %v3629_v26, %s3789_s18  ;;  %2376 = vrot.lane.b32.xlu1 %v3624_v27, %s3789_s18 }
 0x170   : > { %1805 = vrot.lane.b32.xlu0 %v3631_v29, %s3788_s11  ;;  %1445 = vrot.lane.b32.xlu1 %v3626_v31, %s3788_s11  ;;  %v3665_v29 = vld [vmem:[#allocation2 + $0xc] sm:$0xff]  }
 0x174   : > { %1443 = vrot.lane.b32.xlu0 %v3633_v34, %s3788_s11  ;;  %1873 = vrot.lane.b32.xlu1 %v3628_v33, %s3789_s18  ;;  %v3650_v34 = vld [vmem:[#allocation2] sm:$0xff]  }
 0x178   : > { %1801 = vrot.lane.b32.xlu0 %v3635_v62, %s3788_s11  ;;  %1483 = vrot.lane.b32.xlu1 %v3630_v10, %s3789_s18 }
 0x17c   : > { %2314 = vrot.lane.b32.xlu0 %v3637_v1, %s3788_s11  ;;  %1869 = vrot.lane.b32.xlu1 %v3632_v40, %s3789_s18 }
 0x180   : > { %1871 = vrot.lane.b32.xlu0 %v3639_v41, %s3789_s18  ;;  %1875 = vrot.lane.b32.xlu1 %v3634_v43, %s3789_s18 }
 0x184   : > { %2382 = vrot.lane.b32.xlu0 %v3641_v44, %s3789_s18  ;;  %1807 = vrot.lane.b32.xlu1 %v3636_v45, %s3788_s11  ;;  %v3666_v45 = vld [vmem:[#allocation2 + $0xc] sm:$0xff]  }
 0x188   : > { %2386 = vrot.lane.b32.xlu0 %v3643_v47, %s3789_s18  ;;  %1803 = vrot.lane.b32.xlu1 %v3638_v49, %s3788_s11  ;;  %v3653_v47 = vld [vmem:[#allocation2] sm:$0xff]  }
 0x18c   : > { %2318 = vrot.lane.b32.xlu0 %v3645_v6, %s3788_s11  ;;  %2388 = vrot.lane.b32.xlu1 %v3640_v50, %s3789_s18 }
 0x190   : > { %2322 = vrot.lane.b32.xlu0 %v3647_v39, %s3788_s11  ;;  %2320 = vrot.lane.b32.xlu1 %v3642_v51, %s3788_s11 }
 0x194   : > { %2390 = vrot.lane.b32.xlu0 %v3649_v52, %s3789_s18  ;;  %2316 = vrot.lane.b32.xlu1 %v3644_v46, %s3788_s11 }
 0x196   : > { %v1438_v56 = vpop.permute.xlu0 %1437 }
 0x197   : > { %v1493_v35 = vsel %vm697_vm1, %v3650_v34, %v1438_v56  ;;  %v3669_v56 = vld [vmem:[#allocation2 + $0x14] ss:$0 sps:$4 sm:$0x11]  }
 0x198   : > { %2394 = vrot.lane.b32.xlu0 %v3652_v37, %s3789_s18  ;;  %2384 = vrot.lane.b32.xlu1 %v3646_v58, %s3789_s18 }
 0x19a   : > { %v4371_v7 = vpop.permute.xlu0 %1789 }
 0x19b   : > { %v1887_v6 = vsel %vm697_vm1, %v3653_v47, %v4371_v7 }
 0x19c   : > { %2324 = vrot.lane.b32.xlu1 %v3648_v15, %s3788_s11  ;;  %v3659_v15 = vld [vmem:[#allocation2 + $0x8] ss:$0 sps:$4 sm:$0x11]   ;;  %s3013_s11 = ssub.s32 (%p3924_p3), 16, %s3951_s29 }
 0x19d   : > { %p3014_p2 = scmp.lt.s32.totalorder (%p3924_p3), %s3013_s11, 6 }
 0x19e   : > { %v4374_v55 = vpop.permute.xlu0 %2302 }
 0x1a0   : > { %2392 = vrot.lane.b32.xlu1 %v3651_v59, %s3789_s18 }
 0x1a2   : > { %v1490_v61 = vpop.permute.xlu0 %1489  ;;  %v4377_v63 = vpop.permute.xlu1 %1487 }
 0x1a4   : > { %2396 = vrot.lane.b32.xlu1 %v3654_v0, %s3789_s18  ;;  %s597_s18 = sand.u32 1, %s3762_s19  }
 0x1a5   : > { %s3509_s17 = smul.u32 96, %s597_s18 }
 0x1a6   : > { %v1882_v2 = vpop.permute.xlu0 %1881  ;;  %v4380_v3 = vpop.permute.xlu1 %2304 }
 0x1aa   : > { %v4382_v5 = vpop.permute.xlu0 %1791  ;;  %v1810_v22 = vpop.permute.xlu1 %1809 }
 0x1ab   : > { %v1917_v57 = vsel %vm697_vm1, %v3657_v4, %v1810_v22  ;;  %v1890_v7 = vsel %vm697_vm1, %v3659_v15, %v4382_v5  ;;  %v3656_v22 = vld [vmem:[#allocation2] sm:$0xff]  }
 0x1ac   : > { %v1942_v8 = vsel %vm1509_vm5, %v1917_v57, %v1882_v2 }
 0x1ad   : > { %v1998_v11 = vshll.u32 %v1942_v8, 16  ;;  %v1996_v16 = vshrl.u32 %v1942_v8, 16 }
 0x1ae   : > { %v1448_v12 = vpop.permute.xlu0 %1447  ;;  %v1884_v25 = vpop.permute.xlu1 %1883 }
 0x1af   : > { %v1508_v42 = vsel %vm697_vm1, %v3660_v53, %v1448_v12  ;;  %v2000_v18 = vrot.slane %v1998_v11, 1 }
 0x1b0   : > { %v4388_v13 = vsel %vm1509_vm5, %v1508_v42, %v1490_v61  ;;  %v2400_v42 = vsel %vm697_vm1, %v3656_v22, %v4374_v55  ;;  %v3670_v22 = vld [vmem:[#allocation2 + $0x14] ss:$0 sps:$4 sm:$0x11]  }
 0x1b1   : > { %v2001_v14 = vor.u32 %v2000_v18, %v1996_v16 }
 0x1b2   : > { %v4390_v9 = vpop.permute.xlu0 %1877  ;;  %v1812_v54 = vpop.permute.xlu1 %1811 }
 0x1b3   : > { %v1920_v17 = vsel %vm697_vm1, %v3658_v48, %v1812_v54 }
 0x1b4   : > { %v1944_v19 = vsel %vm1509_vm5, %v1920_v17, %v1884_v25  ;;  %v3655_v25 = vld [vmem:[#allocation2 + $0x8] ss:$0 sps:$4 sm:$0x11]  }
 0x1b5   : > { %v2002_v20 = vshll.u32 %v1944_v19, 16  ;;  %v2403_v19 = vsel %vm697_vm1, %v3655_v25, %v4380_v3  ;;  %v3675_v3 = vld [vmem:[#allocation2 + $0x24] sm:$0xff]  }
 0x1b6   : > { %v4394_v21 = vpop.permute.xlu0 %1879  ;;  %v1482_v23 = vpop.permute.xlu1 %1481 }
 0x1b7   : > { %v2004_v24 = vrot.slane %v2002_v20, 1 }
 0x1b9   : > { %v4399_v60 = vsel %vm1945_vm9, %v2001_v14, %v2004_v24 }
 0x1ba   : > { %v4396_v32 = vpop.permute.xlu0 %1797  ;;  %v4401_v26 = vpop.permute.xlu1 %1441 }
 0x1be   : > { %v4403_v27 = vpop.permute.xlu0 %2310  ;;  %v1866_v28 = vpop.permute.xlu1 %1865 }
 0x1c2   : > { %v1440_v31 = vpop.permute.xlu0 %1439  ;;  %v4405_v30 = vpop.permute.xlu1 %2378 }
 0x1c3   : > { %v1496_v33 = vsel %vm697_vm1, %v3665_v29, %v1440_v31 }
 0x1c4   : > { %v1513_v10 = vsel %vm1509_vm5, %v1496_v33, %v1482_v23 }
 0x1c6   : > { %v1794_v36 = vpop.permute.xlu0 %1793  ;;  %v1480_v62 = vpop.permute.xlu1 %1479 }
 0x1c7   : > { %v1511_v1 = vsel %vm1509_vm5, %v1493_v35, %v1480_v62  ;;  %v1893_v49 = vsel %vm697_vm1, %v3666_v45, %v1794_v36 }
 0x1c8   : > { %3434 = vmatprep.mubr.msk.bf16.mxu1 %vm1529_vm10, %v1511_v1  ;;  %v1926_v52 = vsel %vm1509_vm5, %v1893_v49, %v1866_v28  ;;  %v3672_v1 = vld [vmem:[#allocation2 + $0x30] sm:$0xff]  }
 0x1c9   : > { %3435 = vmatmul.mubr.msk.bf16.vlgmr.msra.gmra.mrb[4].mxu1 %vm1529_vm10, %v1513_v10  ;;  %v1958_v37 = vshll.u32 %v1926_v52, 16  ;;  %v1956_v18 = vshrl.u32 %v1926_v52, 16  ;;  %v3661_v10 = vld [vmem:[#allocation2 + $0x18] sm:$0xff]  }
 0x1ca   : > { %v4413_v40 = vpop.permute.xlu0 %2306  ;;  %v1862_v41 = vpop.permute.xlu1 %1861  ;;  %3461 = vmatpush3.bf16.msra.mxu1 %v4351_v38 }
 0x1cb   : > { %v1922_v39 = vsel %vm1509_vm5, %v1887_v6, %v1862_v41  ;;  %v1960_v57 = vrot.slane %v1958_v37, 1  ;;  %v3674_v6 = vld [vmem:[#allocation2 + $0x30] sm:$0xff]  }
 0x1cc   : > { %v1948_v46 = vshll.u32 %v1922_v39, 16  ;;  %v1946_v11 = vshrl.u32 %v1922_v39, 16  ;;  %v3662_v39 = vld [vmem:[#allocation2 + $0x18] sm:$0xff]  }
 0x1cd   : > { %v1961_v14 = vor.u32 %v1960_v57, %v1956_v18 }
 0x1ce   : > { %v2375_v43 = vpop.permute.xlu0 %2374  ;;  %v1868_v44 = vpop.permute.xlu1 %1867  ;;  %v1950_v0 = vrot.slane %v1948_v46, 1 }
 0x1cf   : > { %v2435_v5 = vsel %vm1509_vm5, %v2400_v42, %v2375_v43  ;;  %v1499_v43 = vsel %vm697_vm1, %v3661_v10, %v4401_v26  ;;  %v1899_v26 = vsel %vm697_vm1, %v3662_v39, %v4396_v32 }
 0x1d0   : > { %v1951_v54 = vor.u32 %v1950_v0, %v1946_v11  ;;  %v2471_v28 = vrot.slane %v2435_v5, 1  ;;  %v3668_v0 = vld [vmem:[#allocation2 + $0xc] sm:$0xff]  }
 0x1d1   : > { %v2406_v11 = vsel %vm697_vm1, %v3668_v0, %v4413_v40 }
 0x1d2   : > { %v4419_v50 = vpop.permute.xlu0 %1799  ;;  %v4422_v51 = vpop.permute.xlu1 %2312  ;;  %v2439_v40 = vsel %vm1509_vm5, %v2406_v11, %v4405_v30 }
 0x1d6   : > { %v4425_v38 = vpop.permute.xlu0 %2380  ;;  %v1796_v58 = vpop.permute.xlu1 %1795 }
 0x1d7   : > { %v1896_v59 = vsel %vm697_vm1, %v3669_v56, %v1796_v58  ;;  %v3671_v58 = vld [vmem:[#allocation2 + $0x20] ss:$0 sps:$4 sm:$0x11]  }
 0x1d8   : > { %v1928_v61 = vsel %vm1509_vm5, %v1896_v59, %v1868_v44  ;;  %v3677_v59 = vld [vmem:[#allocation2 + $0x24] sm:$0xff]  }
 0x1d9   : > { %v1962_v2 = vshll.u32 %v1928_v61, 16 }
 0x1da   : > { %v1864_v4 = vpop.permute.xlu0 %1863  ;;  %v4431_v8 = vpop.permute.xlu1 %2308 }
 0x1db   : > { %v1924_v53 = vsel %vm1509_vm5, %v1890_v7, %v1864_v4  ;;  %v1964_v48 = vrot.slane %v1962_v2, 1 }
 0x1dc   : > { %v1952_v12 = vshll.u32 %v1924_v53, 16 }
 0x1dd   : > { %v1965_v55 = vsel %vm1945_vm9, %v1961_v14, %v1964_v48 }
 0x1de   : > { %v1954_v16 = vrot.slane %v1952_v12, 1  ;;  %v1486_v17 = vpop.permute.xlu0 %1485  ;;  %v2377_v20 = vpop.permute.xlu1 %2376 }
 0x1df   : > { %v2437_v23 = vsel %vm1509_vm5, %v2403_v19, %v2377_v20 }
 0x1e0   : > { %v1955_v24 = vsel %vm1945_vm9, %v1951_v54, %v1954_v16  ;;  %v2472_v29 = vrot.slane %v2437_v23, 1  ;;  %v3678_v54 = vld [vmem:[#allocation2 + $0x38] ss:$0 sps:$4 sm:$0x11]  }
 0x1e1   : > { %3448 = vmatprep.mubr.msk.bf16.mxu0 %vm1529_vm10, %v1955_v24 }
 0x1e2   : > { %3449 = vmatmul.mubr.msk.bf16.vlgmr.msra.gmra.mrb[12].mxu0 %vm1529_vm10, %v1965_v55  ;;  %v1806_v31 = vpop.permute.xlu0 %1805  ;;  %v1446_v33 = vpop.permute.xlu1 %1445  ;;  %v2473_v34 = vsel %vm2470_vm15, %v2471_v28, %v2472_v29  ;;  %v3680_v28 = vld [vmem:[#allocation2 + $0x2c] ss:$0 sps:$4 sm:$0x11]   ;;  %v2474_v29 = vrot.slane %v2439_v40, 1 }
 0x1e3   : > { %v1505_v44 = vsel %vm697_vm1, %v3672_v1, %v1446_v33  ;;  %v1911_v52 = vsel %vm697_vm1, %v3674_v6, %v1806_v31  ;;  %v3663_v6 = vld [vmem:[#allocation2 + $0x18] sm:$0xff]  }
 0x1e4   : > { %v1519_v46 = vsel %vm1509_vm5, %v1505_v44, %v4377_v63  ;;  %v1938_v61 = vsel %vm1509_vm5, %v1911_v52, %v4390_v9  ;;  %v1902_v63 = vsel %vm697_vm1, %v3671_v58, %v4419_v50  ;;  %v2409_v9 = vsel %vm697_vm1, %v3670_v22, %v4431_v8  ;;  %v3667_v58 = vld [vmem:[#allocation2 + $0x20] ss:$0 sps:$4 sm:$0x11]  }
 0x1e5   : > { %v1988_v12 = vshll.u32 %v1938_v61, 16  ;;  %v2441_v50 = vsel %vm1509_vm5, %v2409_v9, %v4425_v38  ;;  %v3684_v9 = vld [vmem:[#allocation2 + $0x3c] sm:$0xff]  }
 0x1e6   : > { %v1444_v36 = vpop.permute.xlu0 %1443  ;;  %v1874_v35 = vpop.permute.xlu1 %1873  ;;  %v2475_v38 = vrot.slane %v2441_v50, 1 }
 0x1e7   : > { %v1502_v62 = vsel %vm697_vm1, %v3675_v3, %v1444_v36  ;;  %v1990_v19 = vrot.slane %v1988_v12, 1  ;;  %v3681_v12 = vld [vmem:[#allocation2 + $0x38] ss:$0 sps:$4 sm:$0x11]  }
 0x1e8   : > { %v1517_v47 = vsel %vm1509_vm5, %v1502_v62, %v1486_v17  ;;  %v2476_v36 = vsel %vm2470_vm15, %v2474_v29, %v2475_v38  ;;  %v2844_v29 = vld [vmem:[%s4816_s12] sm:$0x3] }
 0x1e9   : > { %3508 = vmatprep.subr.msk.bf16.mxu1 %vm716_vm0, %v2844_v29 }
 0x1ea   : > { %v1802_v41 = vpop.permute.xlu0 %1801  ;;  %v1484_v45 = vpop.permute.xlu1 %1483 }
 0x1eb   : > { %v1515_v49 = vsel %vm1509_vm5, %v1499_v43, %v1484_v45  ;;  %v1905_v2 = vsel %vm697_vm1, %v3677_v59, %v1802_v41 }
 0x1ec   : > { %3438 = vmatprep.mubr.msk.bf16.mxu1 %vm1529_vm10, %v1515_v49  ;;  %v1934_v18 = vsel %vm1509_vm5, %v1905_v2, %v1874_v35  ;;  %v3682_v49 = vld [vmem:[#allocation2 + $0x2c] ss:$0 sps:$4 sm:$0x11]  }
 0x1ed   : > { %3439 = vmatmul.mubr.msk.bf16.gmra.mrb[8].mxu1 %vm1529_vm10, %v1517_v47  ;;  %v1978_v8 = vshll.u32 %v1934_v18, 16  ;;  %v1976_v62 = vshrl.u32 %v1934_v18, 16 }
 0x1ee   : > { %v4456_v56 = vpop.permute.xlu0 %2314  ;;  %v1870_v37 = vpop.permute.xlu1 %1869  ;;  %3442 = vmatprep.mubr.msk.bf16.mxu1 %vm1529_vm10, %v1519_v46  ;;  %v3679_v46 = vld [vmem:[#allocation2 + $0x24] sm:$0xff]  }
 0x1ef   : > { %v1930_v15 = vsel %vm1509_vm5, %v1899_v26, %v1870_v37  ;;  %v1980_v33 = vrot.slane %v1978_v8, 1  ;;  %v2412_v37 = vsel %vm697_vm1, %v3663_v6, %v4403_v27  ;;  %v2418_v59 = vsel %vm697_vm1, %v3679_v46, %v4456_v56 }
 0x1f0   : > { %v1968_v7 = vshll.u32 %v1930_v15, 16  ;;  %v1966_v25 = vshrl.u32 %v1930_v15, 16 }
 0x1f1   : > { %v1981_v41 = vor.u32 %v1980_v33, %v1976_v62  ;;  %v3688_v33 = vld [vmem:[%s3969_s28 + $0x18] sm:$0xff]  }
 0x1f2   : > { %v1872_v4 = vpop.permute.xlu0 %1871  ;;  %v1970_v32 = vrot.slane %v1968_v7, 1  ;;  %v1876_v57 = vpop.permute.xlu1 %1875  ;;  %v2415_v7 = vsel %vm697_vm1, %v3667_v58, %v4422_v51 }
 0x1f3   : > { %v1932_v53 = vsel %vm1509_vm5, %v1902_v63, %v1872_v4 }
 0x1f4   : > { %v1972_v42 = vshll.u32 %v1932_v53, 16  ;;  %v1971_v48 = vor.u32 %v1970_v32, %v1966_v25  ;;  %v3683_v53 = vld [vmem:[#allocation2 + $0x30] sm:$0xff]  }
 0x1f5   : > { %3443 = vmatmul.mubr.msk.bf16.gmra.mrb[12].mxu1 %vm1529_vm10, %v4388_v13  ;;  %v1986_v13 = vshrl.u32 %v1938_v61, 16 }
 0x1f6   : > { %v1974_v5 = vrot.slane %v1972_v42, 1  ;;  %v2383_v16 = vpop.permute.xlu0 %2382  ;;  %v1808_v17 = vpop.permute.xlu1 %1807  ;;  %3462 = vmatprep.mubr.msk.bf16.mxu1 %vm1529_vm10, %v2473_v34 }
 0x1f7   : > { %v1914_v14 = vsel %vm697_vm1, %v3678_v54, %v1808_v17  ;;  %v1991_v31 = vor.u32 %v1990_v19, %v1986_v13  ;;  %v2443_v61 = vsel %vm1509_vm5, %v2412_v37, %v2383_v16 }
 0x1f8   : > { %v1975_v20 = vsel %vm1945_vm9, %v1971_v48, %v1974_v5  ;;  %v1940_v23 = vsel %vm1509_vm5, %v1914_v14, %v4394_v21  ;;  %v2477_v4 = vrot.slane %v2443_v61, 1  ;;  %v3685_v5 = vld [vmem:[#allocation2 + $0x44] ss:$0 sps:$4 sm:$0x11]  }
 0x1f9   : > { %3452 = vmatprep.mubr.msk.bf16.mxu0 %vm1529_vm10, %v1975_v20  ;;  %v1992_v24 = vshll.u32 %v1940_v23, 16 }
 0x1fa   : > { %v1804_v30 = vpop.permute.xlu1 %1803  ;;  %v2387_v55 = vpop.permute.xlu0 %2386 }
 0x1fb   : > { %v1994_v34 = vrot.slane %v1992_v24, 1  ;;  %v1908_v3 = vsel %vm697_vm1, %v3680_v28, %v1804_v30  ;;  %v2447_v0 = vsel %vm1509_vm5, %v2418_v59, %v2387_v55  ;;  %v3686_v24 = vld [vmem:[%s3969_s28 + $0x8] sm:$0xff]   ;;  %v2703_v28 = vld [vmem:[%s4813_s9] sm:$0x3]  ;;  %v2846_v55 = vsel %vm716_vm0, %v2844_v29, 0 }
 0x1fc   : > { %v1936_v35 = vsel %vm1509_vm5, %v1908_v3, %v1876_v57  ;;  %v2480_v57 = vrot.slane %v2447_v0, 1  ;;  %3507 = vmatprep.subr.msk.bf16.mxu0 %vm716_vm0, %v2703_v28  ;;  %v2723_v30 = vsel %vm716_vm0, %v2703_v28, 0  ;;  %v3690_v3 = vld [vmem:[%s3969_s28 + $0x28] sm:$0xff]   ;;  %vm2991_vm0 = vcmask 130048  }
 0x1fd   : > { %v1982_v10 = vshll.u32 %v1936_v35, 16  ;;  %3463 = vmatmul.mubr.msk.bf16.vlgmr.msra.gmra.mrb[16].mxu1 %vm1529_vm10, %v2476_v36  ;;  %v1995_v21 = vsel %vm1945_vm9, %v1991_v31, %v1994_v34  ;;  %3475 = vmatpush3.bf16.msra.mxu0 %v2723_v30  ;;  %v3687_v31 = vld [vmem:[%s3969_s28 + $0x10] sm:$0xff]   ;;  %v3689_v34 = vld [vmem:[%s3969_s28 + $0x20] sm:$0xff]   ;;  %s4731_s28 = scalar_lea.sflag [#allocation5], %s597_s18 }
 0x1fe   : > { %v2389_v1 = vpop.permute.xlu1 %2388  ;;  %v2319_v44 = vpop.permute.xlu0 %2318  ;;  %3489 = vmatpush3.bf16.msra.mxu1 %v2846_v55  ;;  %v3691_v36 = vld [vmem:[%s3981_s0] sm:$0xff]   ;;  %s4667_s0 = scalar_lea.vmem [#allocation4], %s3509_s17 }
 0x1ff   : > { %v1984_v43 = vrot.slane %v1982_v10, 1  ;;  %v2424_v25 = vsel %vm697_vm1, %v3683_v53, %v2319_v44 }
 0x201   : > { %v1985_v45 = vsel %vm1945_vm9, %v1981_v41, %v1984_v43 }
 0x202   : > { %v2321_v47 = vpop.permute.xlu1 %2320  ;;  %3453 = vmatmul.mubr.msk.bf16.gmra.mrb[16].mxu0 %vm1529_vm10, %v1985_v45  ;;  %v2323_v52 = vpop.permute.xlu0 %2322 }
 0x203   : > { %3456 = vmatprep.mubr.msk.bf16.mxu0 %vm1529_vm10, %v1995_v21  ;;  %v2427_v42 = vsel %vm697_vm1, %v3681_v12, %v2321_v47  ;;  %v2430_v54 = vsel %vm697_vm1, %v3684_v9, %v2323_v52 }
 0x206   : > { %v2317_v39 = vpop.permute.xlu1 %2316  ;;  %v2391_v32 = vpop.permute.xlu0 %2390 }
 0x207   : > { %v2421_v26 = vsel %vm697_vm1, %v3682_v49, %v2317_v39 }
 0x208   : > { %v2449_v15 = vsel %vm1509_vm5, %v2421_v26, %v2389_v1 }
 0x209   : > { %v2481_v2 = vrot.slane %v2449_v15, 1 }
 0x20a   : > { %v2385_v63 = vpop.permute.xlu1 %2384  ;;  %3457 = vmatmul.mubr.msk.bf16.gmra.mrb[20].mxu0 %vm1529_vm10, %v4399_v60  ;;  %v2451_v60 = vsel %vm1509_vm5, %v2424_v25, %v2391_v32  ;;  %v2395_v50 = vpop.permute.xlu0 %2394 }
 0x20b   : > { %v2445_v27 = vsel %vm1509_vm5, %v2415_v7, %v2385_v63  ;;  %v2482_v51 = vsel %vm2470_vm15, %v2480_v57, %v2481_v2  ;;  %v2483_v16 = vrot.slane %v2451_v60, 1  ;;  %v2455_v17 = vsel %vm1509_vm5, %v2430_v54, %v2395_v50 }
 0x20c   : > { %v2478_v22 = vrot.slane %v2445_v27, 1  ;;  %v2486_v38 = vrot.slane %v2455_v17, 1 }
 0x20e   : > { %v2325_v56 = vpop.permute.xlu1 %2324  ;;  %v2479_v11 = vsel %vm2470_vm15, %v2477_v4, %v2478_v22 }
 0x20f   : > { %3466 = vmatprep.mubr.msk.bf16.mxu1 %vm1529_vm10, %v2479_v11  ;;  %v2433_v19 = vsel %vm697_vm1, %v3685_v5, %v2325_v56 }
 0x210   : > { %3467 = vmatmul.mubr.msk.bf16.gmra.mrb[20].mxu1 %vm1529_vm10, %v2482_v51 }
 0x212   : > { %v2393_v18 = vpop.permute.xlu1 %2392 }
 0x213   : > { %v2453_v48 = vsel %vm1509_vm5, %v2427_v42, %v2393_v18 }
 0x214   : > { %v2484_v40 = vrot.slane %v2453_v48, 1 }
 0x216   : > { %v2397_v8 = vpop.permute.xlu1 %2396  ;;  %v2485_v14 = vsel %vm2470_vm15, %v2483_v16, %v2484_v40 }
 0x217   : > { %v2457_v20 = vsel %vm1509_vm5, %v2433_v19, %v2397_v8  ;;  %3470 = vmatprep.mubr.msk.bf16.mxu1 %vm1529_vm10, %v2485_v14  ;;  %v4568_v19 = vld [vmem:[%s4811_s7] ss:$0 sm:$0xff] }
 0x218   : > { %v2487_v23 = vrot.slane %v2457_v20, 1 }
 0x21a   : > { %v2488_v13 = vsel %vm2470_vm15, %v2486_v38, %v2487_v23  ;;  %v4576_v38 = vld [vmem:[%s4812_s8] ss:$0 sm:$0xff] }
 0x21b   : > { %3471 = vmatmul.mubr.msk.bf16.gmra.mrb[24].mxu1 %vm1529_vm10, %v2488_v13 }
 0x21c   : > { %3490 = vmatprep.mubr.msk.bf16.mxu1 %vm697_vm1, %v3686_v24 }
 0x223   : > { %3491 = vmatmul.mubr.msk.bf16.vlgmr.msra.gmra.mrb[28].mxu1 %vm697_vm1, %v3687_v31 }
 0x224   : > { %3494 = vmatprep.mubr.msk.bf16.mxu1 %vm697_vm1, %v3688_v33 }
 0x22b   : > { %3495 = vmatmul.mubr.msk.bf16.gmra.mrb[32].mxu1 %vm697_vm1, %v3689_v34 }
 0x22c   : > { %3498 = vmatprep.mubr.msk.bf16.mxu1 %vm697_vm1, %v3690_v3 }
 0x233   : > { %3499 = vmatmul.mubr.msk.bf16.gmra.mrb[36].mxu1 %vm697_vm1, %v3691_v36 }
 0x29c   : > { %v3436_v35 = vpop.f32.mrb[4].mxu1 }
 0x29d   : > { %1629 = vst.msk [vmem:[#allocation3 + $0x10] sm:$0xff] %vm697_vm1, %v3436_v35  ;;  %v1580_v62 = vpop.f32.mrb[5].mxu1 }
 0x29e   : > { %1627 = vst.msk [vmem:[#allocation3] sm:$0xff] %vm697_vm1, %v1580_v62  ;;  %v3437_v10 = vpop.f32.mrb[6].mxu1 }
 0x29f   : > { %1630 = vst.msk [vmem:[#allocation3 + $0x18] sm:$0xff] %vm697_vm1, %v3437_v10  ;;  %v1583_v21 = vpop.f32.mrb[7].mxu1 }
 0x2a0   : > { %1628 = vst.msk [vmem:[#allocation3 + $0x8] sm:$0xff] %vm697_vm1, %v1583_v21 }
 0x2a4   : > { %v2118_v41 = vld [vmem:[#allocation3 + $0x10] sm:$0xff] }
 0x2a5   : > { %v2116_v45 = vld [vmem:[#allocation3] sm:$0xff] }
 0x2a6   : > { %v2119_v6 = vld [vmem:[#allocation3 + $0x18] sm:$0xff] }
 0x2a7   : > { %v2117_v46 = vld [vmem:[#allocation3 + $0x8] sm:$0xff] }
 0x2b5   : > { %v3450_v1 = vpop.f32.mrb[12].mxu0 }
 0x2b6   : > { %v2130_v43 = vadd.f32 %v3450_v1, %v2118_v41  ;;  %v2069_v44 = vpop.f32.mrb[13].mxu0 }
 0x2b7   : > { %v2128_v47 = vadd.f32 %v2116_v45, %v2069_v44  ;;  %v3451_v49 = vpop.f32.mrb[14].mxu0 }
 0x2b8   : > { %2142 = vst.msk [vmem:[#allocation3 + $0x10] sm:$0xff] %vm697_vm1, %v2130_v43  ;;  %v2131_v39 = vadd.f32 %v3451_v49, %v2119_v6  ;;  %v2072_v52 = vpop.f32.mrb[15].mxu0 }
 0x2b9   : > { %2140 = vst.msk [vmem:[#allocation3] sm:$0xff] %vm697_vm1, %v2128_v47  ;;  %v2129_v26 = vadd.f32 %v2117_v46, %v2072_v52 }
 0x2ba   : > { %2143 = vst.msk [vmem:[#allocation3 + $0x18] sm:$0xff] %vm697_vm1, %v2131_v39 }
 0x2bb   : > { %2141 = vst.msk [vmem:[#allocation3 + $0x8] sm:$0xff] %vm697_vm1, %v2129_v26 }
 0x2bf   : > { %v2601_v27 = vld [vmem:[#allocation3 + $0x10] sm:$0xff] }
 0x2c0   : > { %v3440_v37 = vpop.f32.mrb[8].mxu1  ;;  %v2599_v32 = vld [vmem:[#allocation3] sm:$0xff] }
 0x2c1   : > { %1633 = vst.msk [vmem:[#allocation3 + $0x30] sm:$0xff] %vm697_vm1, %v3440_v37  ;;  %v1596_v58 = vpop.f32.mrb[9].mxu1  ;;  %v2602_v56 = vld [vmem:[#allocation3 + $0x18] sm:$0xff] }
 0x2c2   : > { %1631 = vst.msk [vmem:[#allocation3 + $0x20] sm:$0xff] %vm697_vm1, %v1596_v58  ;;  %v3441_v15 = vpop.f32.mrb[10].mxu1  ;;  %v2600_v12 = vld [vmem:[#allocation3 + $0x8] sm:$0xff] }
 0x2c3   : > { %1634 = vst.msk [vmem:[#allocation3 + $0x38] sm:$0xff] %vm697_vm1, %v3441_v15  ;;  %v1599_v59 = vpop.f32.mrb[11].mxu1 }
 0x2c4   : > { %1632 = vst.msk [vmem:[#allocation3 + $0x28] sm:$0xff] %vm697_vm1, %v1599_v59 }
 0x2c8   : > { %v3444_v61 = vpop.f32.mrb[12].mxu1  ;;  %v2122_v42 = vld [vmem:[#allocation3 + $0x30] sm:$0xff] }
 0x2c9   : > { %1637 = vst.msk [vmem:[#allocation3 + $0x50] sm:$0xff] %vm697_vm1, %v3444_v61  ;;  %v1612_v7 = vpop.f32.mrb[13].mxu1  ;;  %v2120_v50 = vld [vmem:[#allocation3 + $0x20] sm:$0xff] }
 0x2ca   : > { %1635 = vst.msk [vmem:[#allocation3 + $0x40] sm:$0xff] %vm697_vm1, %v1612_v7  ;;  %v3445_v0 = vpop.f32.mrb[14].mxu1  ;;  %v2123_v5 = vld [vmem:[#allocation3 + $0x38] sm:$0xff] }
 0x2cb   : > { %1638 = vst.msk [vmem:[#allocation3 + $0x58] sm:$0xff] %vm697_vm1, %v3445_v0  ;;  %v1615_v63 = vpop.f32.mrb[15].mxu1  ;;  %v2121_v17 = vld [vmem:[#allocation3 + $0x28] sm:$0xff] }
 0x2cc   : > { %1636 = vst.msk [vmem:[#allocation3 + $0x48] sm:$0xff] %vm697_vm1, %v1615_v63 }
 0x2d0   : > { %v3464_v2 = vpop.f32.mrb[16].mxu1  ;;  %v2126_v29 = vld [vmem:[#allocation3 + $0x50] sm:$0xff] }
 0x2d1   : > { %v2613_v4 = vadd.f32 %v3464_v2, %v2601_v27  ;;  %v2552_v22 = vpop.f32.mrb[17].mxu1  ;;  %v2124_v34 = vld [vmem:[#allocation3 + $0x40] sm:$0xff] }
 0x2d2   : > { %v2611_v57 = vadd.f32 %v2599_v32, %v2552_v22  ;;  %v3465_v53 = vpop.f32.mrb[18].mxu1  ;;  %v2127_v10 = vld [vmem:[#allocation3 + $0x58] sm:$0xff] }
 0x2d3   : > { %2625 = vst.msk [vmem:[#allocation3 + $0x10] sm:$0xff] %vm697_vm1, %v2613_v4  ;;  %v2614_v11 = vadd.f32 %v3465_v53, %v2602_v56  ;;  %v2555_v51 = vpop.f32.mrb[19].mxu1  ;;  %v2125_v44 = vld [vmem:[#allocation3 + $0x48] sm:$0xff] }
 0x2d4   : > { %2623 = vst.msk [vmem:[#allocation3] sm:$0xff] %vm697_vm1, %v2611_v57  ;;  %v2612_v25 = vadd.f32 %v2600_v12, %v2555_v51 }
 0x2d5   : > { %v3454_v60 = vpop.f32.mrb[16].mxu0  ;;  %2626 = vst.msk [vmem:[#allocation3 + $0x18] sm:$0xff] %vm697_vm1, %v2614_v11 }
 0x2d6   : > { %v2134_v9 = vadd.f32 %v3454_v60, %v2122_v42  ;;  %v2085_v18 = vpop.f32.mrb[17].mxu0  ;;  %2624 = vst.msk [vmem:[#allocation3 + $0x8] sm:$0xff] %vm697_vm1, %v2612_v25 }
 0x2d7   : > { %v2132_v48 = vadd.f32 %v2120_v50, %v2085_v18  ;;  %v3455_v54 = vpop.f32.mrb[18].mxu0 }
 0x2d8   : > { %2146 = vst.msk [vmem:[#allocation3 + $0x30] sm:$0xff] %vm697_vm1, %v2134_v9  ;;  %v2135_v16 = vadd.f32 %v3455_v54, %v2123_v5  ;;  %v2088_v40 = vpop.f32.mrb[19].mxu0 }
 0x2d9   : > { %2144 = vst.msk [vmem:[#allocation3 + $0x20] sm:$0xff] %vm697_vm1, %v2132_v48  ;;  %v2133_v8 = vadd.f32 %v2121_v17, %v2088_v40 }
 0x2da   : > { %2147 = vst.msk [vmem:[#allocation3 + $0x38] sm:$0xff] %vm697_vm1, %v2135_v16  ;;  %v2637_v14 = vld [vmem:[#allocation3 + $0x10] sm:$0xff] }
 0x2db   : > { %2145 = vst.msk [vmem:[#allocation3 + $0x28] sm:$0xff] %vm697_vm1, %v2133_v8  ;;  %v2635_v20 = vld [vmem:[#allocation3] sm:$0xff]  ;;  %v2656_v23 = vmul.f32 %v4568_v19, %v2637_v14 }
 0x2dc   : > { %v2654_v13 = vmul.f32 %v4568_v19, %v2635_v20  ;;  %v2638_v24 = vld [vmem:[#allocation3 + $0x18] sm:$0xff] }
 0x2dd   : > { %v3458_v28 = vpop.f32.mrb[20].mxu0  ;;  %v2636_v30 = vld [vmem:[#allocation3 + $0x8] sm:$0xff]  ;;  %v2657_v55 = vmul.f32 %v4568_v19, %v2638_v24  ;;  %v2675_v21 = vadd.f32 %v4576_v38, %v2656_v23 }
 0x2de   : > { %v2138_v31 = vadd.f32 %v3458_v28, %v2126_v29  ;;  %v2101_v33 = vpop.f32.mrb[21].mxu0  ;;  %v2655_v3 = vmul.f32 %v4568_v19, %v2636_v30  ;;  %v2673_v36 = vadd.f32 %v4576_v38, %v2654_v13 }
 0x2df   : > { %v2136_v35 = vadd.f32 %v2124_v34, %v2101_v33  ;;  %v3459_v62 = vpop.f32.mrb[22].mxu0  ;;  %v2676_v1 = vadd.f32 %v4576_v38, %v2657_v55  ;;  %v2605_v46 = vld [vmem:[#allocation3 + $0x30] sm:$0xff]  ;;  %v2687_v26 = vmax.f32 %v2675_v21, 0.0 }
 0x2e0   : > { %2150 = vst.msk [vmem:[#allocation3 + $0x50] sm:$0xff] %vm697_vm1, %v2138_v31  ;;  %v2139_v41 = vadd.f32 %v3459_v62, %v2127_v10  ;;  %v2104_v43 = vpop.f32.mrb[23].mxu0  ;;  %v2674_v45 = vadd.f32 %v4576_v38, %v2655_v3  ;;  %v2685_v6 = vmax.f32 %v2673_v36, 0.0  ;;  %v2603_v15 = vld [vmem:[#allocation3 + $0x20] sm:$0xff] }
 0x2e1   : > { %2148 = vst.msk [vmem:[#allocation3 + $0x40] sm:$0xff] %vm697_vm1, %v2136_v35  ;;  %v2137_v47 = vadd.f32 %v2125_v44, %v2104_v43  ;;  %v2688_v49 = vmax.f32 %v2676_v1, 0.0  ;;  %v2606_v0 = vld [vmem:[#allocation3 + $0x38] sm:$0xff] }
 0x2e2   : > { %2151 = vst.msk [vmem:[#allocation3 + $0x58] sm:$0xff] %vm697_vm1, %v2139_v41  ;;  %v2686_v39 = vmax.f32 %v2674_v45, 0.0  ;;  %v2604_v4 = vld [vmem:[#allocation3 + $0x28] sm:$0xff] }
 0x2e3   : > { %2149 = vst.msk [vmem:[#allocation3 + $0x48] sm:$0xff] %vm697_vm1, %v2137_v47  ;;  %v3468_v52 = vpop.f32.mrb[20].mxu1  ;;  %v2698_v63 = vpack.c.bf16 %v2688_v49, %v2687_v26 }
 0x2e4   : > { %v2617_v37 = vadd.f32 %v3468_v52, %v2605_v46  ;;  %v2568_v58 = vpop.f32.mrb[21].mxu1  ;;  %v2697_v59 = vpack.c.bf16 %v2686_v39, %v2685_v6 }
 0x2e5   : > { %v2615_v61 = vadd.f32 %v2603_v15, %v2568_v58  ;;  %v3469_v7 = vpop.f32.mrb[22].mxu1 }
 0x2e6   : > { %2629 = vst.msk [vmem:[#allocation3 + $0x30] sm:$0xff] %vm697_vm1, %v2617_v37  ;;  %v2618_v2 = vadd.f32 %v3469_v7, %v2606_v0  ;;  %v2571_v27 = vpop.f32.mrb[23].mxu1  ;;  %3476 = vmatprep.mubr.msk.bf16.mxu0 %vm697_vm1, %v2697_v59 }
 0x2e7   : > { %2627 = vst.msk [vmem:[#allocation3 + $0x20] sm:$0xff] %vm697_vm1, %v2615_v61  ;;  %v2616_v22 = vadd.f32 %v2604_v4, %v2571_v27  ;;  %3477 = vmatmul.mubr.msk.bf16.vlgmr.msra.gmra.mrb[24].mxu0 %vm697_vm1, %v2698_v63  ;;  %v2609_v53 = vld [vmem:[#allocation3 + $0x50] sm:$0xff]  ;;  %v4638_v4 = vld [vmem:[%s4814_s10] ss:$0 sm:$0xff] }
 0x2e8   : > { %2630 = vst.msk [vmem:[#allocation3 + $0x38] sm:$0xff] %vm697_vm1, %v2618_v2  ;;  %v2607_v25 = vld [vmem:[#allocation3 + $0x40] sm:$0xff] }
 0x2e9   : > { %2628 = vst.msk [vmem:[#allocation3 + $0x28] sm:$0xff] %vm697_vm1, %v2616_v22  ;;  %v2610_v50 = vld [vmem:[#allocation3 + $0x58] sm:$0xff]  ;;  %v4632_v2 = vld [vmem:[%s4817_s13] ss:$0 sm:$0xff] }
 0x2ea   : > { %v2608_v40 = vld [vmem:[#allocation3 + $0x48] sm:$0xff]  ;;  %v4643_v22 = vld [vmem:[%s4818_s14] ss:$0 sm:$0xff] }
 0x2ed   : > { %v2641_v32 = vld [vmem:[#allocation3 + $0x30] sm:$0xff] }
 0x2ee   : > { %v3472_v57 = vpop.f32.mrb[24].mxu1  ;;  %v2639_v56 = vld [vmem:[#allocation3 + $0x20] sm:$0xff]  ;;  %v2660_v11 = vmul.f32 %v4568_v19, %v2641_v32 }
 0x2ef   : > { %v2621_v51 = vadd.f32 %v3472_v57, %v2609_v53  ;;  %v2584_v12 = vpop.f32.mrb[25].mxu1  ;;  %v2658_v60 = vmul.f32 %v4568_v19, %v2639_v56  ;;  %v2642_v42 = vld [vmem:[#allocation3 + $0x38] sm:$0xff]  ;;  %v4650_v56 = vld [vmem:[%s4873_s25] ss:$0 sm:$0xff] }
 0x2f0   : > { %v2619_v9 = vadd.f32 %v2607_v25, %v2584_v12  ;;  %v3473_v18 = vpop.f32.mrb[26].mxu1  ;;  %v2640_v48 = vld [vmem:[#allocation3 + $0x28] sm:$0xff]  ;;  %v2661_v54 = vmul.f32 %v4568_v19, %v2642_v42  ;;  %v2679_v20 = vadd.f32 %v4576_v38, %v2660_v11 }
 0x2f1   : > { %2633 = vst.msk [vmem:[#allocation3 + $0x50] sm:$0xff] %vm697_vm1, %v2621_v51  ;;  %v2622_v5 = vadd.f32 %v3473_v18, %v2610_v50  ;;  %v2587_v16 = vpop.f32.mrb[27].mxu1  ;;  %v2659_v17 = vmul.f32 %v4568_v19, %v2640_v48  ;;  %v2677_v8 = vadd.f32 %v4576_v38, %v2658_v60 }
 0x2f2   : > { %2631 = vst.msk [vmem:[#allocation3 + $0x40] sm:$0xff] %vm697_vm1, %v2619_v9  ;;  %v2620_v14 = vadd.f32 %v2608_v40, %v2587_v16  ;;  %v2680_v23 = vadd.f32 %v4576_v38, %v2661_v54  ;;  %v2691_v30 = vmax.f32 %v2679_v20, 0.0 }
 0x2f3   : > { %2634 = vst.msk [vmem:[#allocation3 + $0x58] sm:$0xff] %vm697_vm1, %v2622_v5  ;;  %v2678_v13 = vadd.f32 %v4576_v38, %v2659_v17  ;;  %v2689_v28 = vmax.f32 %v2677_v8, 0.0 }
 0x2f4   : > { %2632 = vst.msk [vmem:[#allocation3 + $0x48] sm:$0xff] %vm697_vm1, %v2620_v14  ;;  %v2692_v24 = vmax.f32 %v2680_v23, 0.0 }
 0x2f5   : > { %v2690_v29 = vmax.f32 %v2678_v13, 0.0 }
 0x2f6   : > { %v2700_v31 = vpack.c.bf16 %v2692_v24, %v2691_v30  ;;  %v3492_v46 = vpop.f32.mrb[28].mxu1 }
 0x2f7   : > { %v2699_v55 = vpack.c.bf16 %v2690_v29, %v2689_v28  ;;  %v2938_v27 = vmul.f32 %v3492_v46, %v4632_v2 }
 0x2f8   : > { %v2645_v33 = vld [vmem:[#allocation3 + $0x50] sm:$0xff] }
 0x2f9   : > { %3480 = vmatprep.mubr.msk.bf16.mxu0 %vm697_vm1, %v2699_v55  ;;  %v2643_v34 = vld [vmem:[#allocation3 + $0x40] sm:$0xff]  ;;  %v2664_v3 = vmul.f32 %v4568_v19, %v2645_v33  ;;  %v2957_v12 = vadd.f32 %v4643_v22, %v2938_v27 }
 0x2fa   : > { %3481 = vmatmul.mubr.msk.bf16.gmra.mrb[28].mxu0 %vm697_vm1, %v2700_v31  ;;  %v2662_v36 = vmul.f32 %v4568_v19, %v2643_v34  ;;  %v2646_v35 = vld [vmem:[#allocation3 + $0x58] sm:$0xff] }
 0x2fb   : > { %v2644_v62 = vld [vmem:[#allocation3 + $0x48] sm:$0xff]  ;;  %v2665_v10 = vmul.f32 %v4568_v19, %v2646_v35  ;;  %v2683_v41 = vadd.f32 %v4576_v38, %v2664_v3 }
 0x2fc   : > { %v2663_v21 = vmul.f32 %v4568_v19, %v2644_v62  ;;  %v2681_v1 = vadd.f32 %v4576_v38, %v2662_v36  ;;  %v2882_v19 = vpop.f32.mrb[29].mxu1 }
 0x2fd   : > { %v2684_v43 = vadd.f32 %v4576_v38, %v2665_v10  ;;  %v2695_v6 = vmax.f32 %v2683_v41, 0.0  ;;  %v3493_v26 = vpop.f32.mrb[30].mxu1  ;;  %v2936_v32 = vmul.f32 %v4632_v2, %v2882_v19 }
 0x2fe   : > { %v2682_v44 = vadd.f32 %v4576_v38, %v2663_v21  ;;  %v2693_v47 = vmax.f32 %v2681_v1, 0.0  ;;  %v2885_v37 = vpop.f32.mrb[31].mxu1  ;;  %v2939_v57 = vmul.f32 %v3493_v26, %v4632_v2 }
 0x2ff   : > { %v2696_v45 = vmax.f32 %v2684_v43, 0.0  ;;  %v3496_v58 = vpop.f32.mrb[32].mxu1  ;;  %v2937_v11 = vmul.f32 %v4632_v2, %v2885_v37  ;;  %v2955_v42 = vadd.f32 %v4643_v22, %v2936_v32 }
 0x300   : > { %v2694_v49 = vmax.f32 %v2682_v44, 0.0  ;;  %v2898_v15 = vpop.f32.mrb[33].mxu1  ;;  %v2958_v48 = vadd.f32 %v4643_v22, %v2939_v57  ;;  %v2942_v55 = vmul.f32 %v3496_v58, %v4632_v2 }
 0x301   : > { %v2702_v52 = vpack.c.bf16 %v2696_v45, %v2695_v6  ;;  %v3497_v59 = vpop.f32.mrb[34].mxu1  ;;  %v2956_v40 = vadd.f32 %v4643_v22, %v2937_v11  ;;  %v2940_v31 = vmul.f32 %v4632_v2, %v2898_v15 }
 0x302   : > { %v2701_v39 = vpack.c.bf16 %v2694_v49, %v2693_v47  ;;  %v2901_v61 = vpop.f32.mrb[35].mxu1  ;;  %v2943_v33 = vmul.f32 %v3497_v59, %v4632_v2  ;;  %v2961_v35 = vadd.f32 %v4643_v22, %v2942_v55 }
 0x303   : > { %v2941_v3 = vmul.f32 %v4632_v2, %v2901_v61  ;;  %v2959_v21 = vadd.f32 %v4643_v22, %v2940_v31 }
 0x304   : > { %3484 = vmatprep.mubr.msk.bf16.mxu0 %vm697_vm1, %v2701_v39  ;;  %v2962_v44 = vadd.f32 %v4643_v22, %v2943_v33 }
 0x305   : > { %3485 = vmatmul.mubr.msk.bf16.gmra.mrb[32].mxu0 %vm697_vm1, %v2702_v52  ;;  %v2960_v6 = vadd.f32 %v4643_v22, %v2941_v3 }
 0x306   : > { %v4621_v38 = vpop.f32.mrb[36].mxu1 }
 0x307   : > { %v4623_v7 = vpop.f32.mrb[37].mxu1  ;;  %v2946_v59 = vmul.f32 %v4621_v38, %v4632_v2 }
 0x308   : > { %v4625_v0 = vpop.f32.mrb[38].mxu1  ;;  %v2944_v27 = vmul.f32 %v4632_v2, %v4623_v7 }
 0x309   : > { %v4627_v63 = vpop.f32.mrb[39].mxu1  ;;  %v2947_v11 = vmul.f32 %v4625_v0, %v4632_v2 }
 0x30a   : > { %v2945_v7 = vmul.f32 %v4632_v2, %v4627_v63 }
 0x3ba   : > { %v3478_v53 = vpop.f32.mrb[24].mxu0 }
 0x3bb   : > { %v2815_v51 = vmul.f32 %v3478_v53, %v4638_v4  ;;  %v2759_v25 = vpop.f32.mrb[25].mxu0  ;;  %v2965_v53 = vadd.f32 %v4643_v22, %v2946_v59 }
 0x3bc   : > { %v2813_v60 = vmul.f32 %v4638_v4, %v2759_v25  ;;  %v3479_v9 = vpop.f32.mrb[26].mxu0 }
 0x3bd   : > { %v2834_v18 = vadd.f32 %v4650_v56, %v2815_v51  ;;  %v2816_v50 = vmul.f32 %v3479_v9, %v4638_v4  ;;  %v2762_v54 = vpop.f32.mrb[27].mxu0 }
 0x3be   : > { %v2832_v5 = vadd.f32 %v4650_v56, %v2813_v60  ;;  %v2814_v16 = vmul.f32 %v4638_v4, %v2762_v54  ;;  %v2964_v54 = vadd.f32 %v4643_v22, %v2945_v7 }
 0x3bf   : > { %v2969_v17 = vadd.f32 %v2957_v12, %v2834_v18  ;;  %v2835_v8 = vadd.f32 %v4650_v56, %v2816_v50  ;;  %v2963_v12 = vadd.f32 %v4643_v22, %v2944_v27 }
 0x3c0   : > { %v2967_v14 = vadd.f32 %v2955_v42, %v2832_v5  ;;  %v2833_v20 = vadd.f32 %v4650_v56, %v2814_v16 }
 0x3c1   : > { %v2981_v23 = vmax.f32 %v2969_v17, 0.0  ;;  %v2970_v13 = vadd.f32 %v2958_v48, %v2835_v8  ;;  %v2966_v48 = vadd.f32 %v4643_v22, %v2947_v11 }
 0x3c2   : > { %v2979_v24 = vmax.f32 %v2967_v14, 0.0  ;;  %v2968_v28 = vadd.f32 %v2956_v40, %v2833_v20 }
 0x3c3   : > { %2994 = vst.msk [vmem:[%s4667_s0 + $0x10] sm:$0xff] %vm2991_vm0, %v2981_v23  ;;  %v2982_v29 = vmax.f32 %v2970_v13, 0.0 }
 0x3c4   : > { %2992 = vst.msk [vmem:[%s4667_s0] sm:$0xff] %vm2991_vm0, %v2979_v24  ;;  %v2980_v30 = vmax.f32 %v2968_v28, 0.0 }
 0x3c5   : > { %2995 = vst.msk [vmem:[%s4667_s0 + $0x18] sm:$0xff] %vm2991_vm0, %v2982_v29 }
 0x3c6   : > { %2993 = vst.msk [vmem:[%s4667_s0 + $0x8] sm:$0xff] %vm2991_vm0, %v2980_v30 }
 0x3cd   : > { %v3482_v34 = vpop.f32.mrb[28].mxu0 }
 0x3ce   : > { %v2819_v36 = vmul.f32 %v3482_v34, %v4638_v4  ;;  %v2775_v62 = vpop.f32.mrb[29].mxu0 }
 0x3cf   : > { %v2817_v10 = vmul.f32 %v4638_v4, %v2775_v62  ;;  %v3483_v1 = vpop.f32.mrb[30].mxu0 }
 0x3d0   : > { %v2838_v41 = vadd.f32 %v4650_v56, %v2819_v36  ;;  %v2820_v43 = vmul.f32 %v3483_v1, %v4638_v4  ;;  %v2778_v45 = vpop.f32.mrb[31].mxu0 }
 0x3d1   : > { %v2836_v47 = vadd.f32 %v4650_v56, %v2817_v10  ;;  %v2818_v49 = vmul.f32 %v4638_v4, %v2778_v45 }
 0x3d2   : > { %v2973_v39 = vadd.f32 %v2961_v35, %v2838_v41  ;;  %v2839_v52 = vadd.f32 %v4650_v56, %v2820_v43 }
 0x3d3   : > { %v2971_v46 = vadd.f32 %v2959_v21, %v2836_v47  ;;  %v2837_v19 = vadd.f32 %v4650_v56, %v2818_v49 }
 0x3d4   : > { %v2985_v26 = vmax.f32 %v2973_v39, 0.0  ;;  %v2974_v37 = vadd.f32 %v2962_v44, %v2839_v52 }
 0x3d5   : > { %v2983_v58 = vmax.f32 %v2971_v46, 0.0  ;;  %v2972_v15 = vadd.f32 %v2960_v6, %v2837_v19 }
 0x3d6   : > { %2998 = vst.msk [vmem:[%s4667_s0 + $0x30] sm:$0xff] %vm2991_vm0, %v2985_v26  ;;  %v2986_v61 = vmax.f32 %v2974_v37, 0.0 }
 0x3d7   : > { %2996 = vst.msk [vmem:[%s4667_s0 + $0x20] sm:$0xff] %vm2991_vm0, %v2983_v58  ;;  %v2984_v32 = vmax.f32 %v2972_v15, 0.0 }
 0x3d8   : > { %2999 = vst.msk [vmem:[%s4667_s0 + $0x38] sm:$0xff] %vm2991_vm0, %v2986_v61  ;;  %v3486_v57 = vpop.f32.mrb[32].mxu0 }
 0x3d9   : > { %2997 = vst.msk [vmem:[%s4667_s0 + $0x28] sm:$0xff] %vm2991_vm0, %v2984_v32  ;;  %v2823_v38 = vmul.f32 %v3486_v57, %v4638_v4  ;;  %v2791_v51 = vpop.f32.mrb[33].mxu0 }
 0x3da   : > { %v2821_v25 = vmul.f32 %v4638_v4, %v2791_v51  ;;  %v3487_v60 = vpop.f32.mrb[34].mxu0 }
 0x3db   : > { %v2842_v42 = vadd.f32 %v4650_v56, %v2823_v38  ;;  %v2824_v9 = vmul.f32 %v3487_v60, %v4638_v4  ;;  %v2794_v18 = vpop.f32.mrb[35].mxu0 }
 0x3dc   : > { %v2840_v0 = vadd.f32 %v4650_v56, %v2821_v25  ;;  %v2822_v50 = vmul.f32 %v4638_v4, %v2794_v18 }
 0x3dd   : > { %v2977_v63 = vadd.f32 %v2965_v53, %v2842_v42  ;;  %v2843_v2 = vadd.f32 %v4650_v56, %v2824_v9 }
 0x3de   : > { %v2975_v5 = vadd.f32 %v2963_v12, %v2840_v0  ;;  %v2841_v16 = vadd.f32 %v4650_v56, %v2822_v50  ;;  %3011 = sbr.rel (!%p3924_p3) target bundleno = 1027 (0x403), region = 84 }
 0x3df   : > { %v2989_v40 = vmax.f32 %v2977_v63, 0.0  ;;  %v2978_v17 = vadd.f32 %v2966_v48, %v2843_v2 }
 0x3e0   : > { %v2987_v8 = vmax.f32 %v2975_v5, 0.0  ;;  %v2976_v14 = vadd.f32 %v2964_v54, %v2841_v16 }
 0x3e1   : > { %3002 = vst.msk [vmem:[%s4667_s0 + $0x50] sm:$0xff] %vm2991_vm0, %v2989_v40  ;;  %v2990_v20 = vmax.f32 %v2978_v17, 0.0 }
 0x3e2   : > { %3000 = vst.msk [vmem:[%s4667_s0 + $0x40] sm:$0xff] %vm2991_vm0, %v2987_v8  ;;  %v2988_v4 = vmax.f32 %v2976_v14, 0.0 }
 0x3e3   : > { %3003 = vst.msk [vmem:[%s4667_s0 + $0x58] sm:$0xff] %vm2991_vm0, %v2990_v20 }
 0x3e4   : > { %3001 = vst.msk [vmem:[%s4667_s0 + $0x48] sm:$0xff] %vm2991_vm0, %v2988_v4 }
 0x3e5   : > { %s4897_s11 = smov (!%p3014_p2, %s3013_s11), 6 }
 0x3e6   : > { %s4736_s3 = sshll.u32 %s4897_s11, 8 }
 0x3e7   : > { %s3019_s24 = ssub.s32 1536, %s4736_s3 }
 0x3e8   : > { %3020 = vsyncadd %s4731_s28, %s3019_s24  ;;  %p3338_p4 = scmp.ne.s32.totalorder %s4736_s3, 0  ;;  %s3364_s18 = smul.u32 12, %s3770_s21 }
 0x3e9   : > { %s3340_s30 = sshll.u32 %s3774_s22, 5  ;;  %s3029_s26 = sshll.u32 %s4667_s0, 4  ;;  %s4744_s26 = int_to_ptr.vmem [resolvable:$true] %s3029_s26 }
 0x3ea   : > { %s3024_s27 = sadd.s32 %s3364_s18, %s3340_s30  ;;  %s4875_s23 = sld [smem:[#allocation20_spill]] }
 0x3eb   : > { %s3341_s29 = sshll.u32 %s3024_s27, 7  ;;  %s3692_s16 = scalar_lea.vmem %s4744_s26, %s4736_s3 }
 0x3ec   : > { %p3693_p3 = scmp.ne.s32.totalorder %s4744_s26, %s3692_s16  ;;  %s3790_s21 = smov [#allocation4]  }
 0x3ed   : > { %s3696_s22 = sshll.u32 %s3790_s21, 4  ;;  %s3697_s22 = int_to_ptr.vmem [resolvable:$false] %s3696_s22 }
 0x3ee   : > { %p3694_p5 = pnand %p3693_p3, %p3338_p4  ;;  %s3698_s0 = scalar_lea.vmem %s3697_s22, 3072 }
 0x3ef   : > { %p3699_p7 = scmp.lt.s32.totalorder %s4744_s26, %s3697_s22  ;;  %p3700_p9 = scmp.lt.s32.totalorder %s3698_s0, %s3692_s16 }
 0x3f0   : > { %s4876_s17 = smov %s4875_s23  ;;  %s4749_s25 = scalar_lea.hbm %s4875_s23, %s3341_s29 }
 0x3f1   : > { %p3695_p6 = pneg %p3694_p5  ;;  %p3701_p10 = por %p3700_p9, %p3699_p7 }
 0x3f3   : > { %p3702_p11 = pnand %p3701_p10, %p3695_p6 }
 0x3f5   : > { %3705 = shalt.err (!%p3702_p11)
}
 0x3f6   : > { %s3706_s11 = scalar_lea.hbm %s4749_s25, %s4736_s3  ;;  %s3710_s30 = scalar_lea.hbm %s4876_s17, 8192 }
 0x3f7   : > { %p3707_p12 = scmp.ne.s32.totalorder %s4749_s25, %s3706_s11  ;;  %p3711_p1 = scmp.lt.u32.totalorder %s4749_s25, %s4876_s17 }
 0x3f8   : > { %p3712_p2 = scmp.lt.u32.totalorder %s3710_s30, %s3706_s11  ;;  %p3714_p5 = scmp.lt.u32.totalorder %s3706_s11, %s4749_s25 }
 0x3f9   : > { %p3708_p13 = pnand %p3707_p12, %p3338_p4 }
 0x3fa   : > { %p3713_p3 = por %p3712_p2, %p3711_p1 }
 0x3fb   : > { %p3709_p0 = pneg %p3708_p13 }
 0x3fc   : > { %p3715_p6 = por %p3714_p5, %p3713_p3 }
 0x3fe   : > { %p3716_p7 = pnand %p3715_p6, %p3709_p0 }
 0x400   : > { %3719 = shalt.err (!%p3716_p7)
}
 0x401   : > { %s3791_s20 = smov 128   ;;  %s3792_s15 = smov 8  }
 0x402   : > { %3035 = dma.vmem_to_hbm [thread:$0]  (%p3338_p4), %s4744_s26, %s4736_s3, %s4749_s25, %s4731_s28, %s3791_s20, %s3791_s20, %s3792_s15  }
 0x403 PF: > { %s4877_s23 = sld [smem:[#allocation11_spill]]  ;;  %s4878_s16 = sld [smem:[#allocation7_spill]] }
 0x409   : > { %p3516_p9 = scmp.ge.s32.totalorder %s4877_s23, 2  ;;  %s3044_s22 = sand.u32 1, %s4878_s16  }
 0x40a   : > { %s3045_s0 = scalar_lea.sflag [#allocation5], %s3044_s22 }
 0x40b   : > { %p3513_p10 = pnand %p3516_p9, %p3933_p8 }
 0x40d   : > { %3753 = dma.done.wait (!%p3513_p10), %s3045_s0, 1536  }
 0x40e   : > { %3755 = vsyncadd (!%p3513_p10), %s3045_s0, 4294965760  ;;  %s28_s25 = sadd.s32 1, %s4877_s23   ;;  %s4880_s11 = sld [smem:[#allocation8_spill]] }
 0x40f   : > { %p25_p11 = scmp.ge.s32.totalorder %s28_s25, 8   ;;  %s4881_s20 = sld [smem:[#allocation16_spill]] }
 0x410   : > { %s4882_s21 = sld [smem:[#allocation9_spill]]  ;;  %s4883_s22 = sld [smem:[#allocation10_spill]] }
 0x411   : > { %s4884_s23 = sld [smem:[#allocation12_spill]]  ;;  %s4885_s24 = sld [smem:[#allocation14_spill]] }
 0x412   : > { %s4886_s18 = smov %s3762_s19  ;;  %27 = sbr.rel (!%p25_p11) target bundleno = 10 (0xa), region = 126 }
 0x414   : > { %s4887_s19 = smov %s4880_s11 }
 0x419   :  { %3050 = vsyncpa [#allocation5], 1 }
 0x41a   :  { %3052 = vsyncpa [#allocation5 + $0x1], 1 }

</bundles_post_ra>
